<compile_context>
chip_gen: v7x
topology: tpu7x:2x2x1
jax: 0.10.0
libtpu: 0.0.40
codegen_flags: <defaults>
</compile_context>

<pallas_src>
import jax
import jax.numpy as jnp
from jax.experimental import pallas as pl
from jax.experimental.pallas import tpu as pltpu

ABADIA_ACTIONS = 7
BN_EPS = 1e-5

IN_HW = 22                     # input spatial size implied by Linear(288, 7)
K, STRIDE = 5, 2
C1_OUT, C2_OUT = 16, 32
OH1, OH2 = 9, 3                # 22 -> 9 -> 3
BAND1_W = K * IN_HW            # 110 input lanes feeding one conv1 output row
SLAB1_W = OH1 * C1_OUT         # 144 lanes produced per conv1 output row
BAND2_W = K * SLAB1_W          # 720 input lanes feeding one conv2 output row
SLAB2_W = OH2 * C2_OUT         # 96  lanes produced per conv2 output row
N1 = OH1 * SLAB1_W             # 1296 lanes after stage 1, (h, w, c) order
N2 = OH2 * SLAB2_W             # 288  lanes after stage 2, (p, c) order


# ----------------------------------------------------------------------------
# Fused Pallas kernel: whole Policy forward in a single gridless pallas_call
# ----------------------------------------------------------------------------
def policy_fused_kernel(x_ref, wb1_ref, wb2_ref, wh_ref, p_ref, o_ref):
    """x_ref  : (B, 484)   f32  flattened 22x22 input
    wb1_ref: (110, 144) bf16 banded conv1 weight (shared by all 9 output rows)
    wb2_ref: (720, 96)  bf16 banded conv2 weight (shared by all 3 output rows)
    wh_ref : (288, 7)   bf16 head weight, rows permuted to our (p, c) lane order
    p_ref  : (8, 128)   f32  rows 0..4 = bn1_g, bn1_b, bn2_g, bn2_b, head_bias
    o_ref  : (B, 7)     f32  softmax probabilities
    """
    x = x_ref[...]
    batch = x.shape[0]
    prm = p_ref[...]
    g1, b1 = prm[0:1, :C1_OUT], prm[1:2, :C1_OUT]
    g2, b2 = prm[2:3, :C2_OUT], prm[3:4, :C2_OUT]
    bh = prm[4:5, :ABADIA_ACTIONS]

    def fold_matrix(c, n):
        # t[ch, lane] = 1 iff lane % c == ch  (lane layout is c-innermost).
        # c is a power of two (16 / 32) so the mod is a bitwise and.
        lane = jax.lax.broadcasted_iota(jnp.int32, (c, n), 1)
        row = jax.lax.broadcasted_iota(jnp.int32, (c, n), 0)
        return (jnp.bitwise_and(lane, c - 1) == row).astype(jnp.float32)

    def batchnorm_relu(y, gamma, beta, c, n_rows):
        # Training-mode BatchNorm (biased variance, like PyTorch) + ReLU, f32.
        # One iota-generated 0/1 matrix per stage, used transposed for the
        # fold (stats -> channels) and untransposed for the expand
        # (channels -> lanes); stats/scale-shift are stacked so this is only
        # 2 tiny MXU ops per stage.
        t = fold_matrix(c, y.shape[1])                        # (C, N)
        s = jnp.sum(y, axis=0, keepdims=True)
        q = jnp.sum(y * y, axis=0, keepdims=True)
        ss = jnp.concatenate([s, q], axis=0)                  # (2, N)
        ch = jax.lax.dot_general(                             # (2, C) = ss @ t.T
            ss, t, (((1,), (1,)), ((), ())),
            preferred_element_type=jnp.float32)
        inv_n = 1.0 / float(n_rows)
        mean = ch[0:1] * inv_n
        var = jnp.maximum(ch[1:2] * inv_n - mean * mean, 0.0)   # clamp cancellation
        scale = gamma * jax.lax.rsqrt(var + BN_EPS)             # rsqrt -> EUP slot
        shift = beta - mean * scale
        st = jnp.dot(jnp.concatenate([scale, shift], axis=0), t,
                     preferred_element_type=jnp.float32)        # (2, N)
        return jnp.maximum(y * st[0:1] + st[1:2], 0.0)

    # ---- Stage 1: conv1 (banded GEMM per output row) + bn1 + relu -----------
    # Conv biases are intentionally dropped: under training-mode BatchNorm the
    # per-channel bias is removed exactly by the batch-mean subtraction.
    wb1 = wb1_ref[...].astype(jnp.float32)
    slabs = []
    for oh in range(OH1):
        start = STRIDE * oh * IN_HW
        xs = x[:, start:start + BAND1_W]                       # (B, 110)
        slabs.append(jnp.dot(xs, wb1, preferred_element_type=jnp.float32))
    y1 = jnp.concatenate(slabs, axis=1)                        # (B, 1296) (h,w,c)
    y1 = batchnorm_relu(y1, g1, b1, C1_OUT, batch * OH1 * OH1)

    # ---- Stage 2: conv2 (banded GEMM per output row) + bn2 + relu -----------
    wb2 = wb2_ref[...].astype(jnp.float32)
    slabs = []
    for oh in range(OH2):
        start = STRIDE * oh * SLAB1_W
        ys = y1[:, start:start + BAND2_W]                      # (B, 720)
        slabs.append(jnp.dot(ys, wb2, preferred_element_type=jnp.float32))
    y2 = jnp.concatenate(slabs, axis=1)                        # (B, 288) (p,c)
    y2 = batchnorm_relu(y2, g2, b2, C2_OUT, batch * OH2 * OH2)

    # ---- Head: Linear(288 -> 7) + softmax, all f32 ---------------------------
    logits = jnp.dot(y2, wh_ref[...].astype(jnp.float32),
                     preferred_element_type=jnp.float32) + bh
    m = jnp.max(logits, axis=1, keepdims=True)
    e = jnp.exp(logits - m)
    o_ref[...] = e / jnp.sum(e, axis=1, keepdims=True)


def policy_forward(packed, x_nchw):
    """Forward pass equivalent to Policy.forward. x_nchw: (B, 1, 22, 22)."""
    b = x_nchw.shape[0]
    x_flat = x_nchw.reshape(b, IN_HW * IN_HW).astype(jnp.float32)  # free view
    vmem = pl.BlockSpec(memory_space=pltpu.MemorySpace.VMEM)
    flops = (2 * b * (OH1 * BAND1_W * SLAB1_W + OH2 * BAND2_W * SLAB2_W
                      + N2 * ABADIA_ACTIONS)
             + 8 * (N1 * C1_OUT + N2 * C2_OUT))
    bytes_acc = (x_flat.size * 4 + packed["wb1"].size * 2 + packed["wb2"].size * 2
                 + packed["wh"].size * 2 + packed["pslab"].size * 4
                 + b * ABADIA_ACTIONS * 4)
    return pl.pallas_call(
        policy_fused_kernel,
        out_shape=jax.ShapeDtypeStruct((b, ABADIA_ACTIONS), jnp.float32),
        in_specs=[vmem] * 5,
        out_specs=vmem,
        cost_estimate=pl.CostEstimate(flops=flops, transcendentals=64,
                                      bytes_accessed=bytes_acc),
    )(x_flat, packed["wb1"], packed["wb2"], packed["wh"], packed["pslab"])


# ----------------------------------------------------------------------------
# One-time parameter packing (hoisted out of the hot path)
# ----------------------------------------------------------------------------
def _banded_conv_weight(w_pt, in_w, out_w, k, stride):
    """Pack a PyTorch (Cout, Cin, K, K) conv weight into a banded GEMM matrix.

    One conv output row `oh` reads the K input rows [stride*oh, stride*oh+K);
    flattened in (kh, col, cin) order this is a contiguous lane band of the
    (row, col, cin)-flattened input, and the band->output-row weight is
    identical for every oh.  Result: (K*in_w*cin, out_w*cout), output columns
    ordered (ow, cout) to match the kernel's c-innermost lane layout.
    """
    cout, cin, _, _ = w_pt.shape
    w_t = jnp.transpose(w_pt, (2, 3, 1, 0))                   # (kh, kw, cin, cout)
    ow = jnp.arange(out_w)
    col = jnp.arange(in_w)
    kw = col[None, :] - stride * ow[:, None]                   # (out_w, in_w)
    valid = (kw >= 0) & (kw < k)
    band = w_t[:, jnp.clip(kw, 0, k - 1), :, :]                # (kh, ow, col, cin, cout)
    band = band * valid[None, :, :, None, None]
    band = jnp.transpose(band, (0, 2, 3, 1, 4))                # (kh, col, cin, ow, cout)
    return band.reshape(k * in_w * cin, out_w * cout)


def _pack_head(head_w):
    """Fold PyTorch's NCHW flatten (f = c*9 + p) into the head weight rows so
    it directly consumes the kernel's (p, c) lane order.  Shape (288, 7)."""
    w_t = head_w.T.reshape(C2_OUT, OH2 * OH2, ABADIA_ACTIONS)          # (c, p, a)
    return jnp.transpose(w_t, (1, 0, 2)).reshape(N2, ABADIA_ACTIONS)   # (p*32+c, a)


def pack_params(params):
    """One-time packing of PyTorch-layout params into kernel-ready arrays.

    Weights are stored bf16 purely to halve the per-call HBM->VMEM DMA; the
    kernel upcasts and computes in f32.  Conv biases are intentionally NOT
    packed: under training-mode BatchNorm they are removed exactly by the
    batch-mean subtraction (if BN is ever switched to eval-mode running stats,
    the conv biases must be reinstated here).
    """
    wb1 = _banded_conv_weight(params["conv1_w"], IN_HW, OH1, K, STRIDE)  # (110, 144)
    wb2 = _banded_conv_weight(params["conv2_w"], OH1, OH2, K, STRIDE)    # (720, 96)
    wh = _pack_head(params["head_w"])                                    # (288, 7)
    pslab = jnp.zeros((8, 128), jnp.float32)
    pslab = pslab.at[0, :C1_OUT].set(params["bn1_gamma"])
    pslab = pslab.at[1, :C1_OUT].set(params["bn1_beta"])
    pslab = pslab.at[2, :C2_OUT].set(params["bn2_gamma"])
    pslab = pslab.at[3, :C2_OUT].set(params["bn2_beta"])
    pslab = pslab.at[4, :ABADIA_ACTIONS].set(params["head_b"])
    return {
        "wb1": wb1.astype(jnp.bfloat16),
        "wb2": wb2.astype(jnp.bfloat16),
        "wh": wh.astype(jnp.bfloat16),
        "pslab": pslab,
    }


def init_params(key):
    """Deterministic synthetic parameters matching the PyTorch module shapes."""
    ks = jax.random.split(key, 6)
    return {
        # PyTorch layout: conv weight (Cout, Cin, KH, KW), linear weight (out, in)
        "conv1_w": 0.1 * jax.random.normal(ks[0], (16, 1, 5, 5), jnp.float32),
        "conv1_b": 0.1 * jax.random.normal(ks[1], (16,), jnp.float32),
        "bn1_gamma": jnp.ones((16,), jnp.float32),
        "bn1_beta": jnp.zeros((16,), jnp.float32),
        "conv2_w": 0.1 * jax.random.normal(ks[2], (32, 16, 5, 5), jnp.float32),
        "conv2_b": 0.1 * jax.random.normal(ks[3], (32,), jnp.float32),
        "bn2_gamma": jnp.ones((32,), jnp.float32),
        "bn2_beta": jnp.zeros((32,), jnp.float32),
        "head_w": 0.1 * jax.random.normal(ks[4], (ABADIA_ACTIONS, 288), jnp.float32),
        "head_b": 0.1 * jax.random.normal(ks[5], (ABADIA_ACTIONS,), jnp.float32),
    }


# ----------------------------------------------------------------------------
# Pure-JAX reference (for a correctness check against the fused kernel)
# ----------------------------------------------------------------------------
def policy_reference(params, x):
    def conv(inp, w, bias, stride):
        y = jax.lax.conv_general_dilated(
            inp, w, window_strides=(stride, stride), padding="VALID",
            dimension_numbers=("NCHW", "OIHW", "NCHW"))
        return y + bias.reshape(1, -1, 1, 1)

    def bn(inp, gamma, beta):
        mean = jnp.mean(inp, axis=(0, 2, 3), keepdims=True)
        var = jnp.mean((inp - mean) ** 2, axis=(0, 2, 3), keepdims=True)
        xh = (inp - mean) * jax.lax.rsqrt(var + BN_EPS)
        return xh * gamma.reshape(1, -1, 1, 1) + beta.reshape(1, -1, 1, 1)

    h1 = jax.nn.relu(bn(conv(x, params["conv1_w"], params["conv1_b"], STRIDE),
                        params["bn1_gamma"], params["bn1_beta"]))
    h2 = jax.nn.relu(bn(conv(h1, params["conv2_w"], params["conv2_b"], STRIDE),
                        params["bn2_gamma"], params["bn2_beta"]))
    flat = h2.reshape(h2.shape[0], -1)                     # PyTorch NCHW flatten
    logits = flat @ params["head_w"].T + params["head_b"]
    return jax.nn.softmax(logits, axis=1)


if __name__ == "__main__":
    key = jax.random.PRNGKey(0)
    k_params, k_x = jax.random.split(key)
    params = init_params(k_params)
    packed = pack_params(params)          # one-time pack, outside the hot path

    # NCHW input, matching PyTorch: (batch=2, channels=1, 22, 22)
    x = jax.random.normal(k_x, (2, 1, IN_HW, IN_HW), jnp.float32)

    probs = jax.block_until_ready(policy_forward(packed, x))

    assert probs.shape == (2, ABADIA_ACTIONS)
    assert bool(jnp.all(jnp.isfinite(probs)))
    assert bool(jnp.allclose(jnp.sum(probs, axis=1), 1.0, atol=1e-4))

    # Check against the plain-JAX reference of the PyTorch module.  Tolerance
    # reflects the bf16-stored weights (all in-kernel arithmetic is f32).
    ref = jax.block_until_ready(policy_reference(params, x))
    assert bool(jnp.allclose(probs, ref, atol=2e-2, rtol=2e-2))

    print("KERNEL_OK")
</pallas_src>

<mosaic_0001>
module attributes {stable_mosaic.version = 11 : i64} {
  func.func @policy_fused_kernel(%arg0: memref<2x484xf32, #tpu.memory_space<vmem>>, %arg1: memref<110x144xbf16, #tpu.memory_space<vmem>>, %arg2: memref<720x96xbf16, #tpu.memory_space<vmem>>, %arg3: memref<288x7xbf16, #tpu.memory_space<vmem>>, %arg4: memref<8x128xf32, #tpu.memory_space<vmem>>, %arg5: memref<2x7xf32, #tpu.memory_space<vmem>>) attributes {dimension_semantics = [], scalar_prefetch = 0 : i64, scratch_operands = 0 : i64, tpu.core_type = #tpu.core_type<tc>} {
    %c0 = arith.constant 0 : index
    %c0_0 = arith.constant 0 : index
    %0 = vector.load %arg0[%c0, %c0_0] : memref<2x484xf32, #tpu.memory_space<vmem>>, vector<2x484xf32>
    %c0_1 = arith.constant 0 : index
    %c0_2 = arith.constant 0 : index
    %1 = vector.load %arg4[%c0_1, %c0_2] : memref<8x128xf32, #tpu.memory_space<vmem>>, vector<8x128xf32>
    %2 = vector.extract_strided_slice %1 {offsets = [0, 0], sizes = [1, 16], strides = [1, 1]} : vector<8x128xf32> to vector<1x16xf32>
    %3 = vector.extract_strided_slice %1 {offsets = [1, 0], sizes = [1, 16], strides = [1, 1]} : vector<8x128xf32> to vector<1x16xf32>
    %4 = vector.extract_strided_slice %1 {offsets = [2, 0], sizes = [1, 32], strides = [1, 1]} : vector<8x128xf32> to vector<1x32xf32>
    %5 = vector.extract_strided_slice %1 {offsets = [3, 0], sizes = [1, 32], strides = [1, 1]} : vector<8x128xf32> to vector<1x32xf32>
    %6 = vector.extract_strided_slice %1 {offsets = [4, 0], sizes = [1, 7], strides = [1, 1]} : vector<8x128xf32> to vector<1x7xf32>
    %c0_3 = arith.constant 0 : index
    %c0_4 = arith.constant 0 : index
    %7 = vector.load %arg1[%c0_3, %c0_4] : memref<110x144xbf16, #tpu.memory_space<vmem>>, vector<110x144xbf16>
    %8 = arith.extf %7 : vector<110x144xbf16> to vector<110x144xf32>
    %9 = vector.extract_strided_slice %0 {offsets = [0, 0], sizes = [2, 110], strides = [1, 1]} : vector<2x484xf32> to vector<2x110xf32>
    %cst = arith.constant dense<0.000000e+00> : vector<2x144xf32>
    %10 = tpu.matmul %9, %8, %cst {dimension_numbers = #tpu.dot_dimension_numbers<[1], [0], [0], [1], [0, 0, 1, 1], [], []>} : vector<2x110xf32>, vector<110x144xf32>, vector<2x144xf32> -> vector<2x144xf32>
    %11 = vector.extract_strided_slice %0 {offsets = [0, 44], sizes = [2, 110], strides = [1, 1]} : vector<2x484xf32> to vector<2x110xf32>
    %cst_5 = arith.constant dense<0.000000e+00> : vector<2x144xf32>
    %12 = tpu.matmul %11, %8, %cst_5 {dimension_numbers = #tpu.dot_dimension_numbers<[1], [0], [0], [1], [0, 0, 1, 1], [], []>} : vector<2x110xf32>, vector<110x144xf32>, vector<2x144xf32> -> vector<2x144xf32>
    %13 = vector.extract_strided_slice %0 {offsets = [0, 88], sizes = [2, 110], strides = [1, 1]} : vector<2x484xf32> to vector<2x110xf32>
    %cst_6 = arith.constant dense<0.000000e+00> : vector<2x144xf32>
    %14 = tpu.matmul %13, %8, %cst_6 {dimension_numbers = #tpu.dot_dimension_numbers<[1], [0], [0], [1], [0, 0, 1, 1], [], []>} : vector<2x110xf32>, vector<110x144xf32>, vector<2x144xf32> -> vector<2x144xf32>
    %15 = vector.extract_strided_slice %0 {offsets = [0, 132], sizes = [2, 110], strides = [1, 1]} : vector<2x484xf32> to vector<2x110xf32>
    %cst_7 = arith.constant dense<0.000000e+00> : vector<2x144xf32>
    %16 = tpu.matmul %15, %8, %cst_7 {dimension_numbers = #tpu.dot_dimension_numbers<[1], [0], [0], [1], [0, 0, 1, 1], [], []>} : vector<2x110xf32>, vector<110x144xf32>, vector<2x144xf32> -> vector<2x144xf32>
    %17 = vector.extract_strided_slice %0 {offsets = [0, 176], sizes = [2, 110], strides = [1, 1]} : vector<2x484xf32> to vector<2x110xf32>
    %cst_8 = arith.constant dense<0.000000e+00> : vector<2x144xf32>
    %18 = tpu.matmul %17, %8, %cst_8 {dimension_numbers = #tpu.dot_dimension_numbers<[1], [0], [0], [1], [0, 0, 1, 1], [], []>} : vector<2x110xf32>, vector<110x144xf32>, vector<2x144xf32> -> vector<2x144xf32>
    %19 = vector.extract_strided_slice %0 {offsets = [0, 220], sizes = [2, 110], strides = [1, 1]} : vector<2x484xf32> to vector<2x110xf32>
    %cst_9 = arith.constant dense<0.000000e+00> : vector<2x144xf32>
    %20 = tpu.matmul %19, %8, %cst_9 {dimension_numbers = #tpu.dot_dimension_numbers<[1], [0], [0], [1], [0, 0, 1, 1], [], []>} : vector<2x110xf32>, vector<110x144xf32>, vector<2x144xf32> -> vector<2x144xf32>
    %21 = vector.extract_strided_slice %0 {offsets = [0, 264], sizes = [2, 110], strides = [1, 1]} : vector<2x484xf32> to vector<2x110xf32>
    %cst_10 = arith.constant dense<0.000000e+00> : vector<2x144xf32>
    %22 = tpu.matmul %21, %8, %cst_10 {dimension_numbers = #tpu.dot_dimension_numbers<[1], [0], [0], [1], [0, 0, 1, 1], [], []>} : vector<2x110xf32>, vector<110x144xf32>, vector<2x144xf32> -> vector<2x144xf32>
    %23 = vector.extract_strided_slice %0 {offsets = [0, 308], sizes = [2, 110], strides = [1, 1]} : vector<2x484xf32> to vector<2x110xf32>
    %cst_11 = arith.constant dense<0.000000e+00> : vector<2x144xf32>
    %24 = tpu.matmul %23, %8, %cst_11 {dimension_numbers = #tpu.dot_dimension_numbers<[1], [0], [0], [1], [0, 0, 1, 1], [], []>} : vector<2x110xf32>, vector<110x144xf32>, vector<2x144xf32> -> vector<2x144xf32>
    %25 = vector.extract_strided_slice %0 {offsets = [0, 352], sizes = [2, 110], strides = [1, 1]} : vector<2x484xf32> to vector<2x110xf32>
    %cst_12 = arith.constant dense<0.000000e+00> : vector<2x144xf32>
    %26 = tpu.matmul %25, %8, %cst_12 {dimension_numbers = #tpu.dot_dimension_numbers<[1], [0], [0], [1], [0, 0, 1, 1], [], []>} : vector<2x110xf32>, vector<110x144xf32>, vector<2x144xf32> -> vector<2x144xf32>
    %27 = tpu.concatenate %10, %12, %14, %16, %18, %20, %22, %24, %26 in 1 : vector<2x144xf32>, vector<2x144xf32>, vector<2x144xf32>, vector<2x144xf32>, vector<2x144xf32>, vector<2x144xf32>, vector<2x144xf32>, vector<2x144xf32>, vector<2x144xf32> -> vector<2x1296xf32>
    %28 = tpu.iota {dimensions = array<i32: 1>} : vector<16x1296xi32>
    %29 = tpu.iota {dimensions = array<i32: 0>} : vector<16x1296xi32>
    %c15_i32 = arith.constant 15 : i32
    %30 = vector.broadcast %c15_i32 : i32 to vector<16x1296xi32>
    %31 = arith.andi %28, %30 : vector<16x1296xi32>
    %32 = arith.cmpi eq, %31, %29 : vector<16x1296xi32>
    %33 = arith.extui %32 : vector<16x1296xi1> to vector<16x1296xi32>
    %34 = arith.sitofp %33 : vector<16x1296xi32> to vector<16x1296xf32>
    %cst_13 = arith.constant dense<0.000000e+00> : vector<1296xf32>
    %35 = vector.multi_reduction <add>, %27, %cst_13 [0] : vector<2x1296xf32> to vector<1296xf32>
    %36 = vector.shape_cast %35 : vector<1296xf32> to vector<1x1296xf32>
    %37 = arith.mulf %27, %27 : vector<2x1296xf32>
    %cst_14 = arith.constant dense<0.000000e+00> : vector<1296xf32>
    %38 = vector.multi_reduction <add>, %37, %cst_14 [0] : vector<2x1296xf32> to vector<1296xf32>
    %39 = vector.shape_cast %38 : vector<1296xf32> to vector<1x1296xf32>
    %40 = tpu.concatenate %36, %39 in 0 : vector<1x1296xf32>, vector<1x1296xf32> -> vector<2x1296xf32>
    %cst_15 = arith.constant dense<0.000000e+00> : vector<2x16xf32>
    %41 = tpu.matmul %40, %34, %cst_15 {dimension_numbers = #tpu.dot_dimension_numbers<[1], [1], [0], [0], [0, 0, 1, 0], [], []>} : vector<2x1296xf32>, vector<16x1296xf32>, vector<2x16xf32> -> vector<2x16xf32>
    %42 = vector.extract_strided_slice %41 {offsets = [0, 0], sizes = [1, 16], strides = [1, 1]} : vector<2x16xf32> to vector<1x16xf32>
    %cst_16 = arith.constant 0.00617283955 : f32
    %43 = vector.broadcast %cst_16 : f32 to vector<1x16xf32>
    %44 = arith.mulf %42, %43 : vector<1x16xf32>
    %45 = vector.extract_strided_slice %41 {offsets = [1, 0], sizes = [1, 16], strides = [1, 1]} : vector<2x16xf32> to vector<1x16xf32>
    %cst_17 = arith.constant 0.00617283955 : f32
    %46 = vector.broadcast %cst_17 : f32 to vector<1x16xf32>
    %47 = arith.mulf %45, %46 : vector<1x16xf32>
    %48 = arith.mulf %44, %44 : vector<1x16xf32>
    %49 = arith.subf %47, %48 : vector<1x16xf32>
    %cst_18 = arith.constant 0.000000e+00 : f32
    %50 = vector.broadcast %cst_18 : f32 to vector<1x16xf32>
    %51 = arith.maximumf %49, %50 : vector<1x16xf32>
    %cst_19 = arith.constant 9.99999974E-6 : f32
    %52 = vector.broadcast %cst_19 : f32 to vector<1x16xf32>
    %53 = arith.addf %51, %52 : vector<1x16xf32>
    %54 = math.rsqrt %53 : vector<1x16xf32>
    %55 = arith.mulf %2, %54 : vector<1x16xf32>
    %56 = arith.mulf %44, %55 : vector<1x16xf32>
    %57 = arith.subf %3, %56 : vector<1x16xf32>
    %58 = tpu.concatenate %55, %57 in 0 : vector<1x16xf32>, vector<1x16xf32> -> vector<2x16xf32>
    %cst_20 = arith.constant dense<0.000000e+00> : vector<2x1296xf32>
    %59 = tpu.matmul %58, %34, %cst_20 {dimension_numbers = #tpu.dot_dimension_numbers<[1], [0], [0], [1], [0, 0, 1, 1], [], []>} : vector<2x16xf32>, vector<16x1296xf32>, vector<2x1296xf32> -> vector<2x1296xf32>
    %60 = vector.extract_strided_slice %59 {offsets = [0, 0], sizes = [1, 1296], strides = [1, 1]} : vector<2x1296xf32> to vector<1x1296xf32>
    %61 = vector.broadcast %60 : vector<1x1296xf32> to vector<2x1296xf32>
    %62 = arith.mulf %27, %61 : vector<2x1296xf32>
    %63 = vector.extract_strided_slice %59 {offsets = [1, 0], sizes = [1, 1296], strides = [1, 1]} : vector<2x1296xf32> to vector<1x1296xf32>
    %64 = vector.broadcast %63 : vector<1x1296xf32> to vector<2x1296xf32>
    %65 = arith.addf %62, %64 : vector<2x1296xf32>
    %cst_21 = arith.constant 0.000000e+00 : f32
    %66 = vector.broadcast %cst_21 : f32 to vector<2x1296xf32>
    %67 = arith.maximumf %65, %66 : vector<2x1296xf32>
    %c0_22 = arith.constant 0 : index
    %c0_23 = arith.constant 0 : index
    %68 = vector.load %arg2[%c0_22, %c0_23] : memref<720x96xbf16, #tpu.memory_space<vmem>>, vector<720x96xbf16>
    %69 = arith.extf %68 : vector<720x96xbf16> to vector<720x96xf32>
    %70 = vector.extract_strided_slice %67 {offsets = [0, 0], sizes = [2, 720], strides = [1, 1]} : vector<2x1296xf32> to vector<2x720xf32>
    %cst_24 = arith.constant dense<0.000000e+00> : vector<2x96xf32>
    %71 = tpu.matmul %70, %69, %cst_24 {dimension_numbers = #tpu.dot_dimension_numbers<[1], [0], [0], [1], [0, 0, 1, 1], [], []>} : vector<2x720xf32>, vector<720x96xf32>, vector<2x96xf32> -> vector<2x96xf32>
    %72 = vector.extract_strided_slice %67 {offsets = [0, 288], sizes = [2, 720], strides = [1, 1]} : vector<2x1296xf32> to vector<2x720xf32>
    %cst_25 = arith.constant dense<0.000000e+00> : vector<2x96xf32>
    %73 = tpu.matmul %72, %69, %cst_25 {dimension_numbers = #tpu.dot_dimension_numbers<[1], [0], [0], [1], [0, 0, 1, 1], [], []>} : vector<2x720xf32>, vector<720x96xf32>, vector<2x96xf32> -> vector<2x96xf32>
    %74 = vector.extract_strided_slice %67 {offsets = [0, 576], sizes = [2, 720], strides = [1, 1]} : vector<2x1296xf32> to vector<2x720xf32>
    %cst_26 = arith.constant dense<0.000000e+00> : vector<2x96xf32>
    %75 = tpu.matmul %74, %69, %cst_26 {dimension_numbers = #tpu.dot_dimension_numbers<[1], [0], [0], [1], [0, 0, 1, 1], [], []>} : vector<2x720xf32>, vector<720x96xf32>, vector<2x96xf32> -> vector<2x96xf32>
    %76 = tpu.concatenate %71, %73, %75 in 1 : vector<2x96xf32>, vector<2x96xf32>, vector<2x96xf32> -> vector<2x288xf32>
    %77 = tpu.iota {dimensions = array<i32: 1>} : vector<32x288xi32>
    %78 = tpu.iota {dimensions = array<i32: 0>} : vector<32x288xi32>
    %c31_i32 = arith.constant 31 : i32
    %79 = vector.broadcast %c31_i32 : i32 to vector<32x288xi32>
    %80 = arith.andi %77, %79 : vector<32x288xi32>
    %81 = arith.cmpi eq, %80, %78 : vector<32x288xi32>
    %82 = arith.extui %81 : vector<32x288xi1> to vector<32x288xi32>
    %83 = arith.sitofp %82 : vector<32x288xi32> to vector<32x288xf32>
    %cst_27 = arith.constant dense<0.000000e+00> : vector<288xf32>
    %84 = vector.multi_reduction <add>, %76, %cst_27 [0] : vector<2x288xf32> to vector<288xf32>
    %85 = vector.shape_cast %84 : vector<288xf32> to vector<1x288xf32>
    %86 = arith.mulf %76, %76 : vector<2x288xf32>
    %cst_28 = arith.constant dense<0.000000e+00> : vector<288xf32>
    %87 = vector.multi_reduction <add>, %86, %cst_28 [0] : vector<2x288xf32> to vector<288xf32>
    %88 = vector.shape_cast %87 : vector<288xf32> to vector<1x288xf32>
    %89 = tpu.concatenate %85, %88 in 0 : vector<1x288xf32>, vector<1x288xf32> -> vector<2x288xf32>
    %cst_29 = arith.constant dense<0.000000e+00> : vector<2x32xf32>
    %90 = tpu.matmul %89, %83, %cst_29 {dimension_numbers = #tpu.dot_dimension_numbers<[1], [1], [0], [0], [0, 0, 1, 0], [], []>} : vector<2x288xf32>, vector<32x288xf32>, vector<2x32xf32> -> vector<2x32xf32>
    %91 = vector.extract_strided_slice %90 {offsets = [0, 0], sizes = [1, 32], strides = [1, 1]} : vector<2x32xf32> to vector<1x32xf32>
    %cst_30 = arith.constant 0.055555556 : f32
    %92 = vector.broadcast %cst_30 : f32 to vector<1x32xf32>
    %93 = arith.mulf %91, %92 : vector<1x32xf32>
    %94 = vector.extract_strided_slice %90 {offsets = [1, 0], sizes = [1, 32], strides = [1, 1]} : vector<2x32xf32> to vector<1x32xf32>
    %cst_31 = arith.constant 0.055555556 : f32
    %95 = vector.broadcast %cst_31 : f32 to vector<1x32xf32>
    %96 = arith.mulf %94, %95 : vector<1x32xf32>
    %97 = arith.mulf %93, %93 : vector<1x32xf32>
    %98 = arith.subf %96, %97 : vector<1x32xf32>
    %cst_32 = arith.constant 0.000000e+00 : f32
    %99 = vector.broadcast %cst_32 : f32 to vector<1x32xf32>
    %100 = arith.maximumf %98, %99 : vector<1x32xf32>
    %cst_33 = arith.constant 9.99999974E-6 : f32
    %101 = vector.broadcast %cst_33 : f32 to vector<1x32xf32>
    %102 = arith.addf %100, %101 : vector<1x32xf32>
    %103 = math.rsqrt %102 : vector<1x32xf32>
    %104 = arith.mulf %4, %103 : vector<1x32xf32>
    %105 = arith.mulf %93, %104 : vector<1x32xf32>
    %106 = arith.subf %5, %105 : vector<1x32xf32>
    %107 = tpu.concatenate %104, %106 in 0 : vector<1x32xf32>, vector<1x32xf32> -> vector<2x32xf32>
    %cst_34 = arith.constant dense<0.000000e+00> : vector<2x288xf32>
    %108 = tpu.matmul %107, %83, %cst_34 {dimension_numbers = #tpu.dot_dimension_numbers<[1], [0], [0], [1], [0, 0, 1, 1], [], []>} : vector<2x32xf32>, vector<32x288xf32>, vector<2x288xf32> -> vector<2x288xf32>
    %109 = vector.extract_strided_slice %108 {offsets = [0, 0], sizes = [1, 288], strides = [1, 1]} : vector<2x288xf32> to vector<1x288xf32>
    %110 = vector.broadcast %109 : vector<1x288xf32> to vector<2x288xf32>
    %111 = arith.mulf %76, %110 : vector<2x288xf32>
    %112 = vector.extract_strided_slice %108 {offsets = [1, 0], sizes = [1, 288], strides = [1, 1]} : vector<2x288xf32> to vector<1x288xf32>
    %113 = vector.broadcast %112 : vector<1x288xf32> to vector<2x288xf32>
    %114 = arith.addf %111, %113 : vector<2x288xf32>
    %cst_35 = arith.constant 0.000000e+00 : f32
    %115 = vector.broadcast %cst_35 : f32 to vector<2x288xf32>
    %116 = arith.maximumf %114, %115 : vector<2x288xf32>
    %c0_36 = arith.constant 0 : index
    %c0_37 = arith.constant 0 : index
    %117 = vector.load %arg3[%c0_36, %c0_37] : memref<288x7xbf16, #tpu.memory_space<vmem>>, vector<288x7xbf16>
    %118 = arith.extf %117 : vector<288x7xbf16> to vector<288x7xf32>
    %cst_38 = arith.constant dense<0.000000e+00> : vector<2x7xf32>
    %119 = tpu.matmul %116, %118, %cst_38 {dimension_numbers = #tpu.dot_dimension_numbers<[1], [0], [0], [1], [0, 0, 1, 1], [], []>} : vector<2x288xf32>, vector<288x7xf32>, vector<2x7xf32> -> vector<2x7xf32>
    %120 = vector.broadcast %6 : vector<1x7xf32> to vector<2x7xf32>
    %121 = arith.addf %119, %120 : vector<2x7xf32>
    %cst_39 = arith.constant dense<0xFF800000> : vector<2xf32>
    %122 = vector.multi_reduction <maximumf>, %121, %cst_39 [1] : vector<2x7xf32> to vector<2xf32>
    %123 = vector.shape_cast %122 : vector<2xf32> to vector<2x1xf32>
    %124 = vector.broadcast %123 : vector<2x1xf32> to vector<2x7xf32>
    %125 = arith.subf %121, %124 : vector<2x7xf32>
    %126 = math.exp %125 : vector<2x7xf32>
    %cst_40 = arith.constant dense<0.000000e+00> : vector<2xf32>
    %127 = vector.multi_reduction <add>, %126, %cst_40 [1] : vector<2x7xf32> to vector<2xf32>
    %128 = vector.shape_cast %127 : vector<2xf32> to vector<2x1xf32>
    %129 = vector.broadcast %128 : vector<2x1xf32> to vector<2x7xf32>
    %130 = arith.divf %126, %129 : vector<2x7xf32>
    %c0_41 = arith.constant 0 : index
    %c0_42 = arith.constant 0 : index
    %131 = vector.load %arg5[%c0_41, %c0_42] : memref<2x7xf32, #tpu.memory_space<vmem>>, vector<2x7xf32>
    tpu.vector_store %arg5[%c0_41, %c0_42], %130 {strides = array<i32>} : memref<2x7xf32, #tpu.memory_space<vmem>>, vector<2x7xf32>,
    return
  }
}

</mosaic_0001>

<bundles_post_ra>
// kernel: tpu_custom_call.1
= control target key start
LH: loop header
LB: loop body
LE: loop exit
PB: predicated region body
PF: predicated region fallthrough
CT: control target
= control target key end

     0   :  { %v150_v0 = vlaneseq  ;;  %v5401_v1 = vmov 1983009808   ;;  %v6850_v12 = vmov 0.0   ;;  %s5403_s6 = smov 40   ;;  %s5404_s7 = smov 84   ;;  %s6830_s0 = inlined_call_operand.vmem [shape: f32[2,484], index: 0, kind: input, shape index: {}]   ;;  %s6831_s1 = inlined_call_operand.vmem [shape: bf16[110,144], index: 1, kind: input, shape index: {}]   ;;  %s6832_s2 = inlined_call_operand.vmem [shape: bf16[720,96], index: 2, kind: input, shape index: {}]   ;;  %s6833_s3 = inlined_call_operand.vmem [shape: bf16[288,7], index: 3, kind: input, shape index: {}]   ;;  %s6834_s4 = inlined_call_operand.vmem [shape: f32[8,128], index: 4, kind: input, shape index: {}]   ;;  %s6835_s5 = inlined_call_operand.hbm [shape: f32[2,7], index: 5, kind: output, shape index: {}]  }
   0x1   :  { %v148_v2 = vunpack.c.l.s4 %v5401_v1  ;;  %v5454_v3 = vld [vmem:[%s6831_s1 + $0x4] ss:$8 sps:$4 sm:$0xff]   ;;  %v5462_v5 = vld [vmem:[%s6831_s1] ss:$8 sps:$4 sm:$0xff]   ;;  %v5468_v7 = vld [vmem:[%s6831_s1 + $0x14] ss:$8 sps:$4 sm:$0xff]   ;;  %140 = vmatprep.mubr.f32.mxu0 %v6850_v12  ;;  %227 = vmatprep.mubr.f32.mxu1 %v6850_v12 }
   0x2   :  { %v5457_v4 = vshrl.u32 %v150_v0, 7  ;;  %4476 = vmatprep.subr.bf16.mxu0 %v5454_v3  ;;  %4506 = vmatprep.subr.bf16.mxu1 %v5454_v3  ;;  %v5474_v8 = vld [vmem:[%s6830_s0] sm:$0xff]  ;;  %v5480_v9 = vld [vmem:[%s6831_s1 + $0x10] ss:$8 sps:$4 sm:$0xff]   ;;  %v5505_v16 = vld [vmem:[%s6831_s1 + $0x34] ss:$8 sps:$4 sm:$0xff]  }
   0x3   :  { %v149_v6 = vunpack.c.0.s8 %v148_v2  ;;  %4478 = vmatpush1.bf16.msra.mxu0 %v5462_v5  ;;  %4508 = vmatpush1.bf16.msra.mxu1 %v5462_v5  ;;  %v5489_v11 = vld [vmem:[%s6831_s1 + $0x24] ss:$8 sps:$4 sm:$0xff]   ;;  %v5498_v14 = vld [vmem:[%s6831_s1 + $0x20] ss:$8 sps:$4 sm:$0xff]  }
   0x4   :  { %6870 = vst [vmem:[#allocation5_spill] sm:$0xff] %v5457_v4  ;;  %4480 = vmatprep.subr.bf16.mxu0 %v5468_v7  ;;  %4510 = vmatprep.subr.bf16.mxu1 %v5468_v7 }
   0x5   :  { %v152_v10 = vsub.s32 %v149_v6, %v5457_v4 }
   0x7   :  { %v153_v13 = vrot.slane %v5474_v8, %v152_v10  ;;  %4482 = vmatpush1.bf16.msra.mxu0 %v5480_v9  ;;  %4512 = vmatpush1.bf16.msra.mxu1 %v5480_v9 }
   0x8   :  { %4484 = vmatprep.subr.bf16.mxu0 %v5489_v11  ;;  %4514 = vmatprep.subr.bf16.mxu1 %v5489_v11 }
   0x9   :  { %234 = vrot.lane.b32.xlu1 %v153_v13, %s5403_s6  ;;  %v154_v15 = vcombine.high %v153_v13, %v153_v13  ;;  %155 = vrot.lane.b32.xlu0 %v153_v13, %s5404_s7 }
   0xa   :  { %10 = vsyncpa [#allocation3], 0  ;;  %v5512_v17 = vld [vmem:[%s6831_s1 + $0x30] ss:$8 sps:$4 sm:$0xff]   ;;  %v388_v18 = vcombine.high %v5474_v8, %v5474_v8  ;;  %v5521_v19 = vld [vmem:[%s6831_s1 + $0x44] ss:$8 sps:$4 sm:$0xff]  }
   0xb   :  { %4486 = vmatpush1.bf16.msra.mxu0 %v5498_v14  ;;  %4516 = vmatpush1.bf16.msra.mxu1 %v5498_v14  ;;  %v5528_v20 = vld [vmem:[%s6831_s1 + $0x40] ss:$8 sps:$4 sm:$0xff]   ;;  %s5405_s16 = smov 124   ;;  %s5406_s17 = smov 80   ;;  %v5536_v22 = vld [vmem:[%s6831_s1 + $0x54] ss:$8 sps:$4 sm:$0xff]  }
   0xc   :  { %4488 = vmatprep.subr.bf16.mxu0 %v5505_v16  ;;  %4518 = vmatprep.subr.bf16.mxu1 %v5505_v16  ;;  %v395_v21 = vrot.slane %v388_v18, %v152_v10  ;;  %v5543_v23 = vld [vmem:[%s6831_s1 + $0x50] ss:$8 sps:$4 sm:$0xff]   ;;  %vm69_vm0 = vcmask 1045504   ;;  %s5407_s22 = smov 36   ;;  %vm5408_vm1 = vmmov 1   ;;  %s5409_s27 = smov 120  }
   0xd   :  { %236 = vrot.lane.b32.xlu1 %v154_v15, %s5403_s6  ;;  %157 = vrot.lane.b32.xlu0 %v154_v15, %s5404_s7  ;;  %v5551_v24 = vld [vmem:[%s6831_s1 + $0x64] ss:$8 sps:$4 sm:$0x7f]   ;;  %vm5554_vm2 = vmpackc.low %vm69_vm0, %vm5408_vm1  ;;  %v5562_v26 = vld [vmem:[%s6831_s1 + $0x60] ss:$8 sps:$4 sm:$0x7f]  }
   0xe   :  { %v629_v27 = vcombine.high %v395_v21, %v395_v21  ;;  %vm65_vm3 = vcmask 900096   ;;  %s5410_s1 = smov 76   ;;  %s5411_s28 = smov 32   ;;  %vm238_vm4 = vcmask 326656   ;;  %vm159_vm5 = vcmask 687104   ;;  %v6225_v6 = vld [vmem:[%s6832_s2 + $0x80] sm:$0xff]  }
   0xf   :  { %4490 = vmatpush1.bf16.msra.mxu0 %v5512_v17  ;;  %4520 = vmatpush1.bf16.msra.mxu1 %v5512_v17  ;;  %vm6841_vm6 = vcmask 654336   ;;  %vm479_vm7 = vcmask 293888   ;;  %vm634_vm8 = vcmask 621568   ;;  %vm6838_vm9 = vcmask 261120   ;;  %s5413_s29 = smov 16   ;;  %s5414_s0 = smov 48  }
  0x10   :  { %4492 = vmatprep.subr.bf16.mxu0 %v5521_v19  ;;  %4522 = vmatprep.subr.bf16.mxu1 %v5521_v19  ;;  %v5729_v50 = vand.u32 127, %v150_v0  ;;  %v5735_v52 = vadd.s32 8, %v5457_v4  ;;  %v6852_v61 = vmov 1.0|1.0   ;;  %s5415_s30 = smov 64   ;;  %s5416_s6 = smov 96  }
  0x11   :  { %313 = vrot.lane.b32.xlu0 %v154_v15, %s5405_s16  ;;  %396 = vrot.lane.b32.xlu1 %v154_v15, %s5406_s17  ;;  %s5417_s7 = smov 112  }
  0x12   :  { %v5732_v51 = vadd.s32 128, %v5729_v50  ;;  %6873 = vst [vmem:[#allocation6_spill] sm:$0xff] %v5735_v52  ;;  %v878_v56 = vand.u32 15, %v5729_v50  ;;  %v867_v62 = vadd.s32 384, %v5729_v50  ;;  %v5767_v63 = vadd.s32 256, %v5729_v50 }
  0x13   :  { %4494 = vmatpush1.bf16.msra.mxu0 %v5528_v20  ;;  %4524 = vmatpush1.bf16.msra.mxu1 %v5528_v20 }
  0x14   :  { %4496 = vmatprep.subr.bf16.mxu0 %v5536_v22  ;;  %4526 = vmatprep.subr.bf16.mxu1 %v5536_v22  ;;  %v879_v53 = vand.u32 15, %v5732_v51  ;;  %vm5744_vm13 = vcmp.eq.s32.totalorder %v878_v56, %v5457_v4  ;;  %vm5749_vm14 = vcmp.eq.s32.totalorder %v878_v56, %v5735_v52  ;;  %6878 = vst [vmem:[#allocation7_spill] sm:$0xff] %v5767_v63  ;;  %v881_v0 = vand.u32 15, %v867_v62 }
  0x15   :  { %398 = vrot.lane.b32.xlu0 %v395_v21, %s5406_s17  ;;  %475 = vrot.lane.b32.xlu1 %v154_v15, %s5407_s22  ;;  %vm4747_vm15 = vmpackc.low %vm5749_vm14, %vm5744_vm13  ;;  %v880_v1 = vand.u32 15, %v5767_v63  ;;  %vm6839_vm13 = vcmask 523264   ;;  %v6238_v15 = vld [vmem:[%s6832_s2 + $0x88] sm:$0xff]  }
  0x16   :  { %vm890_vm10 = vcmp.eq.s32.totalorder %v879_v53, %v5457_v4  ;;  %vm901_vm11 = vcmp.eq.s32.totalorder %v879_v53, %v5735_v52  ;;  %vm5771_vm0 = vcmp.eq.s32.totalorder %v881_v0, %v5457_v4  ;;  %vm5776_vm1 = vcmp.eq.s32.totalorder %v881_v0, %v5735_v52 }
  0x17   :  { %4498 = vmatpush1.bf16.msra.mxu0 %v5543_v23  ;;  %4528 = vmatpush1.bf16.msra.mxu1 %v5543_v23  ;;  %vm4745_vm12 = vmpackc.low %vm901_vm11, %vm890_vm10  ;;  %vm6847_vm11 = vcmask 1041408  }
  0x18   :  { %4501 = vmatprep.subr.msk.bf16.mxu0 %vm5554_vm2, %v5551_v24  ;;  %4531 = vmatprep.subr.msk.bf16.mxu1 %vm5554_vm2, %v5551_v24 }
  0x19   :  { %477 = vrot.lane.b32.xlu0 %v395_v21, %s5407_s22  ;;  %554 = vrot.lane.b32.xlu1 %v395_v21, %s5409_s27 }
  0x1b   :  { %4504 = vmatpush1.bf16.msk.msra.mxu0 %vm5554_vm2, %v5562_v26  ;;  %4534 = vmatpush1.bf16.msk.msra.mxu1 %vm5554_vm2, %v5562_v26 }
  0x1c   :  { %4536 = vmatprep.subr.bf16.mxu0 %v5454_v3  ;;  %4566 = vmatprep.subr.bf16.mxu1 %v5454_v3 }
  0x1d   :  { %632 = vrot.lane.b32.xlu1 %v629_v27, %s5410_s1  ;;  %630 = vrot.lane.b32.xlu0 %v395_v21, %s5410_s1 }
  0x1e   :  { %3708 = vmatmul.mubr.msk.f32.vlgmr.msra.gmra.mrb[0].mxu0 %vm65_vm3, %v5474_v8 }
  0x1f   :  { %4538 = vmatpush1.bf16.msra.mxu0 %v5462_v5  ;;  %306 = vmatprep.mubr.f32.mxu0 %v6850_v12 }
  0x20   :  { %4540 = vmatprep.subr.bf16.mxu0 %v5468_v7 }
  0x21   :  { %711 = vrot.lane.b32.xlu1 %v629_v27, %s5411_s28  ;;  %709 = vrot.lane.b32.xlu0 %v395_v21, %s5411_s28 }
  0x23   :  { %4542 = vmatpush1.bf16.msra.mxu0 %v5480_v9 }
  0x24   :  { %4544 = vmatprep.subr.bf16.mxu0 %v5489_v11 }
  0x27   :  { %4546 = vmatpush1.bf16.msra.mxu0 %v5498_v14 }
  0x28   :  { %4548 = vmatprep.subr.bf16.mxu0 %v5505_v16 }
  0x2b   :  { %4550 = vmatpush1.bf16.msra.mxu0 %v5512_v17 }
  0x2c   :  { %4552 = vmatprep.subr.bf16.mxu0 %v5521_v19 }
  0x2f   :  { %4554 = vmatpush1.bf16.msra.mxu0 %v5528_v20 }
  0x30   :  { %4556 = vmatprep.subr.bf16.mxu0 %v5536_v22 }
  0x33   :  { %4558 = vmatpush1.bf16.msra.mxu0 %v5543_v23 }
  0x34   :  { %4561 = vmatprep.subr.msk.bf16.mxu0 %vm5554_vm2, %v5551_v24 }
  0x37   :  { %4564 = vmatpush1.bf16.msk.msra.mxu0 %vm5554_vm2, %v5562_v26 }
  0x38   :  { %4596 = vmatprep.subr.bf16.mxu0 %v5454_v3 }
  0x7b   :  { %v235_v28 = vpop.permute.xlu1 %234  ;;  %v156_v29 = vpop.permute.xlu0 %155 }
  0x7f   :  { %v237_v30 = vpop.permute.xlu1 %236  ;;  %v158_v31 = vpop.permute.xlu0 %157 }
  0x80   :  { %v239_v32 = vsel %vm238_vm4, %v235_v28, %v237_v30  ;;  %v160_v33 = vsel %vm159_vm5, %v156_v29, %v158_v31  ;;  %vm5790_vm4 = vcmp.eq.s32.totalorder %v880_v1, %v5735_v52 }
  0x81   :  { %3711 = vmatmul.mubr.msk.f32.vlgmr.msra.gmra.mrb[0].mxu1 %vm65_vm3, %v160_v33  ;;  %3714 = vmatmul.mubr.msk.f32.vlgmr.msra.gmra.mrb[2].mxu0 %vm65_vm3, %v239_v32 }
  0x82   :  { %4568 = vmatpush1.bf16.msra.mxu1 %v5462_v5  ;;  %4598 = vmatpush1.bf16.msra.mxu0 %v5462_v5 }
  0x83   :  { %4570 = vmatprep.subr.bf16.mxu1 %v5468_v7  ;;  %4600 = vmatprep.subr.bf16.mxu0 %v5468_v7  ;;  %v314_v34 = vpop.permute.xlu0 %313  ;;  %v397_v35 = vpop.permute.xlu1 %396 }
  0x84   :  { %381 = vmatprep.mubr.f32.mxu1 %v6850_v12  ;;  %468 = vmatprep.mubr.f32.mxu0 %v6850_v12 }
  0x86   :  { %4572 = vmatpush1.bf16.msra.mxu1 %v5480_v9  ;;  %4602 = vmatpush1.bf16.msra.mxu0 %v5480_v9 }
  0x87   :  { %4574 = vmatprep.subr.bf16.mxu1 %v5489_v11  ;;  %4604 = vmatprep.subr.bf16.mxu0 %v5489_v11  ;;  %v399_v36 = vpop.permute.xlu0 %398  ;;  %v476_v38 = vpop.permute.xlu1 %475 }
  0x88   :  { %v401_v37 = vsel %vm6841_vm6, %v397_v35, %v399_v36 }
  0x8a   :  { %4576 = vmatpush1.bf16.msra.mxu1 %v5498_v14  ;;  %4606 = vmatpush1.bf16.msra.mxu0 %v5498_v14 }
  0x8b   :  { %4578 = vmatprep.subr.bf16.mxu1 %v5505_v16  ;;  %4608 = vmatprep.subr.bf16.mxu0 %v5505_v16  ;;  %v478_v39 = vpop.permute.xlu0 %477  ;;  %v555_v41 = vpop.permute.xlu1 %554 }
  0x8c   :  { %v480_v40 = vsel %vm479_vm7, %v476_v38, %v478_v39 }
  0x8e   :  { %4580 = vmatpush1.bf16.msra.mxu1 %v5512_v17  ;;  %4610 = vmatpush1.bf16.msra.mxu0 %v5512_v17 }
  0x8f   :  { %4582 = vmatprep.subr.bf16.mxu1 %v5521_v19  ;;  %4612 = vmatprep.subr.bf16.mxu0 %v5521_v19  ;;  %v633_v42 = vpop.permute.xlu1 %632  ;;  %v631_v43 = vpop.permute.xlu0 %630 }
  0x90   :  { %v635_v46 = vsel %vm634_vm8, %v631_v43, %v633_v42 }
  0x92   :  { %4584 = vmatpush1.bf16.msra.mxu1 %v5528_v20  ;;  %4614 = vmatpush1.bf16.msra.mxu0 %v5528_v20 }
  0x93   :  { %4586 = vmatprep.subr.bf16.mxu1 %v5536_v22  ;;  %4616 = vmatprep.subr.bf16.mxu0 %v5536_v22  ;;  %v712_v44 = vpop.permute.xlu1 %711  ;;  %v710_v45 = vpop.permute.xlu0 %709 }
  0x94   :  { %v714_v47 = vsel %vm6838_vm9, %v710_v45, %v712_v44 }
  0x96   :  { %4588 = vmatpush1.bf16.msra.mxu1 %v5543_v23  ;;  %4618 = vmatpush1.bf16.msra.mxu0 %v5543_v23 }
  0x97   :  { %4591 = vmatprep.subr.msk.bf16.mxu1 %vm5554_vm2, %v5551_v24  ;;  %4621 = vmatprep.subr.msk.bf16.mxu0 %vm5554_vm2, %v5551_v24 }
  0x9a   :  { %4594 = vmatpush1.bf16.msk.msra.mxu1 %vm5554_vm2, %v5562_v26  ;;  %4624 = vmatpush1.bf16.msk.msra.mxu0 %vm5554_vm2, %v5562_v26 }
  0x9b   :  { %4626 = vmatprep.subr.bf16.mxu1 %v5454_v3  ;;  %4656 = vmatprep.subr.bf16.mxu0 %v5454_v3 }
  0x9d   :  { %3717 = vmatmul.mubr.msk.f32.vlgmr.msra.gmra.mrb[2].mxu1 %vm65_vm3, %v314_v34  ;;  %3720 = vmatmul.mubr.msk.f32.vlgmr.msra.gmra.mrb[4].mxu0 %vm65_vm3, %v401_v37 }
  0x9e   :  { %4628 = vmatpush1.bf16.msra.mxu1 %v5462_v5  ;;  %4658 = vmatpush1.bf16.msra.mxu0 %v5462_v5 }
  0x9f   :  { %4630 = vmatprep.subr.bf16.mxu1 %v5468_v7  ;;  %4660 = vmatprep.subr.bf16.mxu0 %v5468_v7 }
  0xa0   :  { %547 = vmatprep.mubr.f32.mxu1 %v6850_v12  ;;  %622 = vmatprep.mubr.f32.mxu0 %v6850_v12 }
  0xa2   :  { %4632 = vmatpush1.bf16.msra.mxu1 %v5480_v9  ;;  %4662 = vmatpush1.bf16.msra.mxu0 %v5480_v9 }
  0xa3   :  { %4634 = vmatprep.subr.bf16.mxu1 %v5489_v11  ;;  %4664 = vmatprep.subr.bf16.mxu0 %v5489_v11 }
  0xa6   :  { %4636 = vmatpush1.bf16.msra.mxu1 %v5498_v14  ;;  %4666 = vmatpush1.bf16.msra.mxu0 %v5498_v14 }
  0xa7   :  { %4638 = vmatprep.subr.bf16.mxu1 %v5505_v16  ;;  %4668 = vmatprep.subr.bf16.mxu0 %v5505_v16 }
  0xaa   :  { %4640 = vmatpush1.bf16.msra.mxu1 %v5512_v17  ;;  %4670 = vmatpush1.bf16.msra.mxu0 %v5512_v17 }
  0xab   :  { %4642 = vmatprep.subr.bf16.mxu1 %v5521_v19  ;;  %4672 = vmatprep.subr.bf16.mxu0 %v5521_v19 }
  0xae   :  { %4644 = vmatpush1.bf16.msra.mxu1 %v5528_v20  ;;  %4674 = vmatpush1.bf16.msra.mxu0 %v5528_v20 }
  0xaf   :  { %4646 = vmatprep.subr.bf16.mxu1 %v5536_v22  ;;  %4676 = vmatprep.subr.bf16.mxu0 %v5536_v22 }
  0xb2   :  { %4648 = vmatpush1.bf16.msra.mxu1 %v5543_v23  ;;  %4678 = vmatpush1.bf16.msra.mxu0 %v5543_v23 }
  0xb3   :  { %4651 = vmatprep.subr.msk.bf16.mxu1 %vm5554_vm2, %v5551_v24  ;;  %4681 = vmatprep.subr.msk.bf16.mxu0 %vm5554_vm2, %v5551_v24 }
  0xb6   :  { %4654 = vmatpush1.bf16.msk.msra.mxu1 %vm5554_vm2, %v5562_v26  ;;  %4684 = vmatpush1.bf16.msk.msra.mxu0 %vm5554_vm2, %v5562_v26 }
  0xb7   :  { %4686 = vmatprep.subr.bf16.mxu1 %v5454_v3  ;;  %4716 = vmatprep.subr.bf16.mxu0 %v5454_v3 }
  0xb9   :  { %3723 = vmatmul.mubr.msk.f32.vlgmr.msra.gmra.mrb[4].mxu1 %vm65_vm3, %v480_v40  ;;  %3726 = vmatmul.mubr.msk.f32.vlgmr.msra.gmra.mrb[6].mxu0 %vm65_vm3, %v555_v41 }
  0xba   :  { %4688 = vmatpush1.bf16.msra.mxu1 %v5462_v5  ;;  %702 = vmatprep.mubr.f32.mxu1 %v6850_v12 }
  0xbb   :  { %4690 = vmatprep.subr.bf16.mxu1 %v5468_v7  ;;  %4718 = vmatpush1.bf16.msra.mxu0 %v5462_v5  ;;  %v6215_v5 = vld [vmem:[%s6832_s2 + $0xc0] sm:$0xff]  }
  0xbc   :  { %4720 = vmatprep.subr.bf16.mxu0 %v5468_v7  ;;  %781 = vmatprep.mubr.f32.mxu0 %v6850_v12 }
  0xbe   :  { %4692 = vmatpush1.bf16.msra.mxu1 %v5480_v9 }
  0xbf   :  { %4694 = vmatprep.subr.bf16.mxu1 %v5489_v11  ;;  %4722 = vmatpush1.bf16.msra.mxu0 %v5480_v9 }
  0xc0   :  { %4724 = vmatprep.subr.bf16.mxu0 %v5489_v11  ;;  %v869_v11 = vadd.s32 640, %v5729_v50 }
  0xc2   :  { %4696 = vmatpush1.bf16.msra.mxu1 %v5498_v14  ;;  %v883_v13 = vand.u32 15, %v869_v11 }
  0xc3   :  { %4698 = vmatprep.subr.bf16.mxu1 %v5505_v16  ;;  %4726 = vmatpush1.bf16.msra.mxu0 %v5498_v14  ;;  %v6230_v14 = vld [vmem:[%s6832_s2 + $0xc8] sm:$0xff]  }
  0xc4   :  { %4728 = vmatprep.subr.bf16.mxu0 %v5505_v16  ;;  %vm5814_vm7 = vcmp.eq.s32.totalorder %v883_v13, %v5457_v4  ;;  %vm5819_vm8 = vcmp.eq.s32.totalorder %v883_v13, %v5735_v52 }
  0xc5   :  { %vm6836_vm10 = vmpackc.low %vm5819_vm8, %vm5814_vm7 }
  0xc6   :  { %4700 = vmatpush1.bf16.msra.mxu1 %v5512_v17 }
  0xc7   :  { %4702 = vmatprep.subr.bf16.mxu1 %v5521_v19  ;;  %4730 = vmatpush1.bf16.msra.mxu0 %v5512_v17 }
  0xc8   :  { %4732 = vmatprep.subr.bf16.mxu0 %v5521_v19 }
  0xca   :  { %4704 = vmatpush1.bf16.msra.mxu1 %v5528_v20 }
  0xcb   :  { %4706 = vmatprep.subr.bf16.mxu1 %v5536_v22  ;;  %4734 = vmatpush1.bf16.msra.mxu0 %v5528_v20 }
  0xcc   :  { %4736 = vmatprep.subr.bf16.mxu0 %v5536_v22 }
  0xce   :  { %4708 = vmatpush1.bf16.msra.mxu1 %v5543_v23 }
  0xcf   :  { %4711 = vmatprep.subr.msk.bf16.mxu1 %vm5554_vm2, %v5551_v24  ;;  %4738 = vmatpush1.bf16.msra.mxu0 %v5543_v23 }
  0xd0   :  { %4741 = vmatprep.subr.msk.bf16.mxu0 %vm5554_vm2, %v5551_v24 }
  0xd2   :  { %4714 = vmatpush1.bf16.msk.msra.mxu1 %vm5554_vm2, %v5562_v26 }
  0xd3   :  { %4744 = vmatpush1.bf16.msk.msra.mxu0 %vm5554_vm2, %v5562_v26  ;;  %vm4749_vm2 = vmpackc.low %vm5776_vm1, %vm5771_vm0 }
  0xd4   :  { %4746 = vmatprep.subr.msk.bf16.mxu0 %vm4745_vm12, %v6852_v61  ;;  %4750 = vmatprep.subr.msk.bf16.mxu1 %vm4749_vm2, %v6852_v61 }
  0xd5   :  { %3729 = vmatmul.mubr.msk.f32.vlgmr.msra.gmra.mrb[6].mxu1 %vm65_vm3, %v635_v46 }
  0xd6   :  { %3732 = vmatmul.mubr.msk.f32.vlgmr.msra.gmra.mrb[8].mxu0 %vm65_vm3, %v714_v47  ;;  %vm5785_vm3 = vcmp.eq.s32.totalorder %v880_v1, %v5457_v4 }
  0xd7   :  { %vm6837_vm5 = vmpackc.low %vm5790_vm4, %vm5785_vm3 }
  0xdb   :  { %4752 = vmatpush1.bf16.xpose.msk.msra.mxu1 %vm6837_vm5, %v6852_v61  ;;  %vm813_vm5 = vcmask 392192  }
  0xdc   :  { %4748 = vmatpush1.bf16.xpose.msk.msra.mxu0 %vm4747_vm15, %v6852_v61  ;;  %4754 = vmatprep.subr.msk.bf16.mxu1 %vm6836_vm10, %v6852_v61  ;;  %vm6845_vm10 = vcmask 1040384  }
  0xdd   :  { %4770 = vmatprep.subr.msk.bf16.mxu0 %vm4745_vm12, %v6852_v61  ;;  %vm6843_vm12 = vcmask 130048  }
  0xf1   :  { %v5724_v48 = vpop.f32.mrb[0].mxu0 }
  0xf2   :  { %v5726_v49 = vpop.f32.mrb[1].mxu0  ;;  %v1034_v24 = vmul.f32 %v5724_v48, %v5724_v48  ;;  %v956_v25 = vsel %vm6847_vm11, %v5724_v48, 0.0 }
  0xf3   :  { %v957_v27 = vrot.slane %v956_v25, 4 }
  0xf4   :  { %v1045_v26 = vsel %vm6847_vm11, %v1034_v24, 0.0 }
  0xf5   :  { %v1046_v28 = vrot.slane %v1045_v26, 4  ;;  %v958_v31 = vadd.f32 %v957_v27, %v956_v25 }
  0xf7   :  { %v1047_v32 = vadd.f32 %v1046_v28, %v1045_v26  ;;  %v959_v35 = vrot.slane %v958_v31, 2 }
  0xf9   :  { %v1048_v36 = vrot.slane %v1047_v32, 2  ;;  %v960_v45 = vadd.f32 %v959_v35, %v958_v31  ;;  %v868_v35 = vadd.s32 512, %v5729_v50 }
  0xfb   :  { %v1049_v46 = vadd.f32 %v1048_v36, %v1047_v32  ;;  %v961_v56 = vrot.slane %v960_v45, 1  ;;  %v871_v36 = vadd.s32 896, %v5729_v50 }
 0x154   :  { %v229_v54 = vpop.f32.mrb[0].mxu1  ;;  %v308_v55 = vpop.f32.mrb[2].mxu0 }
 0x155   :  { %v231_v57 = vpop.f32.mrb[1].mxu1  ;;  %800 = vrot.lane.b32.xlu0 %v308_v55, %s5411_s28  ;;  %v310_v58 = vpop.f32.mrb[3].mxu0 }
 0x156   :  { %802 = vrot.lane.b32.xlu1 %v310_v58, %s5411_s28 }
 0x159   :  { %790 = vrot.lane.b32.xlu0 %v229_v54, %s5413_s29 }
 0x15a   :  { %792 = vrot.lane.b32.xlu1 %v231_v57, %s5413_s29  ;;  %v1050_v57 = vrot.slane %v1049_v46, 1 }
 0x170   :  { %v383_v7 = vpop.f32.mrb[2].mxu1  ;;  %v470_v8 = vpop.f32.mrb[4].mxu0 }
 0x171   :  { %v385_v9 = vpop.f32.mrb[3].mxu1  ;;  %809 = vrot.lane.b32.xlu0 %v383_v7, %s5414_s0  ;;  %819 = vrot.lane.b32.xlu1 %v470_v8, %s5415_s30  ;;  %v472_v10 = vpop.f32.mrb[5].mxu0  ;;  %v962_v7 = vadd.f32 %v961_v56, %v960_v45  ;;  %v1051_v8 = vadd.f32 %v1050_v57, %v1049_v46  ;;  %v885_v45 = vand.u32 15, %v871_v36  ;;  %v870_v36 = vadd.s32 768, %v5729_v50  ;;  %v6243_v57 = vld [vmem:[%s6832_s2 + $0xd0] sm:$0xff]  }
 0x173   :  { %vm5905_vm0 = vcmp.eq.s32.totalorder %v885_v45, %v5457_v4  ;;  %vm5912_vm1 = vcmp.eq.s32.totalorder %v885_v45, %v5735_v52  ;;  %v884_v45 = vand.u32 15, %v870_v36 }
 0x175   :  { %811 = vrot.lane.b32.xlu1 %v385_v9, %s5414_s0  ;;  %821 = vrot.lane.b32.xlu0 %v472_v10, %s5415_s30 }
 0x18c   :  { %v549_v16 = vpop.f32.mrb[4].mxu1  ;;  %v624_v17 = vpop.f32.mrb[6].mxu0 }
 0x18d   :  { %v551_v18 = vpop.f32.mrb[5].mxu1  ;;  %829 = vrot.lane.b32.xlu0 %v549_v16, %s5406_s17  ;;  %838 = vrot.lane.b32.xlu1 %v624_v17, %s5416_s6  ;;  %v626_v19 = vpop.f32.mrb[7].mxu0 }
 0x191   :  { %831 = vrot.lane.b32.xlu1 %v551_v18, %s5406_s17  ;;  %840 = vrot.lane.b32.xlu0 %v626_v19, %s5416_s6  ;;  %v1123_v18 = vsel %vm6845_vm10, %v962_v7, %v1051_v8  ;;  %v6262_v8 = vld [vmem:[%s6832_s2 + $0x98] sm:$0xff]  }
 0x1a8   :  { %v704_v20 = vpop.f32.mrb[6].mxu1 }
 0x1a9   :  { %v706_v21 = vpop.f32.mrb[7].mxu1  ;;  %848 = vrot.lane.b32.xlu0 %v704_v20, %s5417_s7  ;;  %v5837_v22 = vpop.f32.mrb[8].mxu0 }
 0x1aa   :  { %850 = vrot.lane.b32.xlu1 %v706_v21, %s5417_s7  ;;  %v5839_v23 = vpop.f32.mrb[9].mxu0 }
 0x1c7   :  { %v801_v29 = vpop.permute.xlu0 %800 }
 0x1c8   :  { %v803_v30 = vpop.permute.xlu1 %802 }
 0x1c9   :  { %v804_v21 = vsel %vm6838_vm9, %v801_v29, %v803_v30 }
 0x1cb   :  { %v791_v33 = vpop.permute.xlu0 %790 }
 0x1cc   :  { %v5848_v34 = vsel %vm6843_vm12, %v5726_v49, %v791_v33  ;;  %v793_v39 = vpop.permute.xlu1 %792 }
 0x1cd   :  { %v963_v37 = vsel %vm6847_vm11, %v5848_v34, 0.0  ;;  %v1035_v38 = vmul.f32 %v5848_v34, %v5848_v34  ;;  %v795_v44 = vsel %vm6843_vm12, %v791_v33, %v793_v39 }
 0x1ce   :  { %v964_v40 = vrot.slane %v963_v37, 4  ;;  %v5857_v53 = vsel %vm6838_vm9, %v795_v44, %v801_v29  ;;  %v882_v44 = vand.u32 15, %v868_v35  ;;  %vm6844_vm9 = vcmask 785408  }
 0x1cf   :  { %v1052_v41 = vsel %vm6847_vm11, %v1035_v38, 0.0  ;;  %v1036_v58 = vmul.f32 %v5857_v53, %v5857_v53  ;;  %v970_v13 = vsel %vm6847_vm11, %v5857_v53, 0.0 }
 0x1d0   :  { %v965_v42 = vadd.f32 %v964_v40, %v963_v37  ;;  %v1053_v43 = vrot.slane %v1052_v41, 4  ;;  %v971_v19 = vrot.slane %v970_v13, 4  ;;  %vm5895_vm14 = vcmp.eq.s32.totalorder %v882_v44, %v5457_v4 }
 0x1d1   :  { %v1059_v9 = vsel %vm6847_vm11, %v1036_v58, 0.0  ;;  %v6250_v58 = vld [vmem:[%s6832_s2 + $0x90] sm:$0xff]  }
 0x1d2   :  { %v966_v47 = vrot.slane %v965_v42, 2  ;;  %v1054_v49 = vadd.f32 %v1053_v43, %v1052_v41  ;;  %v1060_v17 = vrot.slane %v1059_v9, 4  ;;  %v972_v24 = vadd.f32 %v971_v19, %v970_v13 }
 0x1d4   :  { %v967_v54 = vadd.f32 %v966_v47, %v965_v42  ;;  %v1055_v55 = vrot.slane %v1054_v49, 2  ;;  %v1061_v20 = vadd.f32 %v1060_v17, %v1059_v9  ;;  %v973_v28 = vrot.slane %v972_v24, 2 }
 0x1d6   :  { %v968_v62 = vrot.slane %v967_v54, 1  ;;  %v1056_v0 = vadd.f32 %v1055_v55, %v1054_v49  ;;  %v1062_v26 = vrot.slane %v1061_v20, 2  ;;  %v974_v39 = vadd.f32 %v973_v28, %v972_v24 }
 0x1d8   :  { %v1057_v1 = vrot.slane %v1056_v0, 1  ;;  %v969_v10 = vadd.f32 %v968_v62, %v967_v54  ;;  %v1063_v30 = vadd.f32 %v1062_v26, %v1061_v20  ;;  %v975_v54 = vrot.slane %v974_v39, 1  ;;  %v6255_v62 = vld [vmem:[%s6832_s2 + $0xd8] sm:$0xff]  }
 0x1da   :  { %v1058_v11 = vadd.f32 %v1057_v1, %v1056_v0  ;;  %v1064_v43 = vrot.slane %v1063_v30, 1  ;;  %v976_v9 = vadd.f32 %v975_v54, %v974_v39 }
 0x1dc   :  { %v1124_v16 = vsel %vm6845_vm10, %v969_v10, %v1058_v11  ;;  %v1065_v56 = vadd.f32 %v1064_v43, %v1063_v30 }
 0x1dd   :  { %1207 = vmatprep.mubr.f32.mxu0 %v1124_v16 }
 0x1de   :  { %1208 = vmatmul.mubr.f32.vlgmr.msra.gmra.mrb[10].mxu0 %v1123_v18  ;;  %v1125_v11 = vsel %vm6845_vm10, %v976_v9, %v1065_v56  ;;  %v6274_v9 = vld [vmem:[%s6832_s2 + $0xa0] sm:$0xff]  }
 0x1df   :  { %4772 = vmatpush1.bf16.msk.msra.mxu0 %vm4747_vm15, %v6852_v61  ;;  %1649 = vmatprep.mubr.f32.mxu0 %v6850_v12  ;;  %vm5900_vm15 = vcmp.eq.s32.totalorder %v882_v44, %v5735_v52  ;;  %v874_v12 = vadd.s32 1280, %v5729_v50 }
 0x1e0   :  { %4774 = vmatprep.subr.msk.bf16.mxu0 %vm4749_vm2, %v6852_v61  ;;  %vm6842_vm2 = vmpackc.low %vm5900_vm15, %vm5895_vm14 }
 0x1e3   :  { %v810_v25 = vpop.permute.xlu0 %809  ;;  %v820_v60 = vpop.permute.xlu1 %819 }
 0x1e4   :  { %v5881_v59 = vsel %vm813_vm5, %v804_v21, %v810_v25 }
 0x1e5   :  { %v977_v27 = vsel %vm6847_vm11, %v5881_v59, 0.0  ;;  %v1037_v3 = vmul.f32 %v5881_v59, %v5881_v59 }
 0x1e6   :  { %v978_v2 = vrot.slane %v977_v27, 4 }
 0x1e7   :  { %v1066_v31 = vsel %vm6847_vm11, %v1037_v3, 0.0  ;;  %v812_v29 = vpop.permute.xlu1 %811  ;;  %v822_v18 = vpop.permute.xlu0 %821 }
 0x1e8   :  { %v979_v32 = vadd.f32 %v978_v2, %v977_v27  ;;  %v1067_v33 = vrot.slane %v1066_v31, 4  ;;  %v814_v42 = vsel %vm813_vm5, %v810_v25, %v812_v29  ;;  %vm6840_vm5 = vmpackc.low %vm5912_vm1, %vm5905_vm0  ;;  %v824_v24 = vsel %vm6839_vm13, %v820_v60, %v822_v18 }
 0x1e9   :  { %v5892_v49 = vsel %vm6839_vm13, %v814_v42, %v820_v60  ;;  %vm5957_vm13 = vcmp.eq.s32.totalorder %v884_v45, %v5457_v4 }
 0x1ea   :  { %v980_v37 = vrot.slane %v979_v32, 2  ;;  %v1068_v38 = vadd.f32 %v1067_v33, %v1066_v31  ;;  %v1038_v0 = vmul.f32 %v5892_v49, %v5892_v49  ;;  %v984_v16 = vsel %vm6847_vm11, %v5892_v49, 0.0 }
 0x1eb   :  { %v985_v19 = vrot.slane %v984_v16, 4 }
 0x1ec   :  { %v981_v40 = vadd.f32 %v980_v37, %v979_v32  ;;  %v1069_v41 = vrot.slane %v1068_v38, 2  ;;  %v1073_v13 = vsel %vm6847_vm11, %v1038_v0, 0.0  ;;  %v873_v37 = vadd.s32 1152, %v5729_v50 }
 0x1ed   :  { %v1074_v17 = vrot.slane %v1073_v13, 4  ;;  %v986_v21 = vadd.f32 %v985_v19, %v984_v16  ;;  %v1043_v19 = vmul.f32 %v5837_v22, %v5837_v22 }
 0x1ee   :  { %v982_v46 = vrot.slane %v981_v40, 1  ;;  %v1070_v47 = vadd.f32 %v1069_v41, %v1068_v38 }
 0x1ef   :  { %v1075_v20 = vadd.f32 %v1074_v17, %v1073_v13  ;;  %v987_v32 = vrot.slane %v986_v21, 2  ;;  %v6905_v17 = vmov 0 }
 0x1f0   :  { %v1071_v55 = vrot.slane %v1070_v47, 1  ;;  %v983_v1 = vadd.f32 %v982_v46, %v981_v40  ;;  %v887_v46 = vand.u32 15, %v873_v37 }
 0x1f1   :  { %v1076_v3 = vrot.slane %v1075_v20, 2  ;;  %v988_v40 = vadd.f32 %v987_v32, %v986_v21 }
 0x1f2   :  { %v1072_v7 = vadd.f32 %v1071_v55, %v1070_v47 }
 0x1f3   :  { %v1077_v60 = vadd.f32 %v1076_v3, %v1075_v20  ;;  %v989_v56 = vrot.slane %v988_v40, 1  ;;  %v1108_v3 = vsel %vm6847_vm11, %v1043_v19, 0.0 }
 0x1f4   :  { %v1126_v10 = vsel %vm6845_vm10, %v983_v1, %v1072_v7  ;;  %v6899_v7 = vmov 0 }
 0x1f5   :  { %1277 = vmatprep.mubr.f32.mxu1 %v1126_v10  ;;  %v1078_v44 = vrot.slane %v1077_v60, 1  ;;  %v6900_v7 = vsel %vm5957_vm13, 4294967295, %v6899_v7  ;;  %v6903_v10 = vmov 0  ;;  %v990_v18 = vadd.f32 %v989_v56, %v988_v40 }
 0x1f6   :  { %1278 = vmatmul.mubr.f32.vlgmr.msra.gmra.mrb[8].mxu1 %v1125_v11 }
 0x1f7   :  { %4756 = vmatpush1.bf16.xpose.msk.msra.mxu1 %vm6842_vm2, %v6852_v61  ;;  %v1079_v1 = vadd.f32 %v1078_v44, %v1077_v60  ;;  %vm5974_vm2 = vcmp.eq.s32.totalorder %v887_v46, %v5735_v52 }
 0x1f8   :  { %4758 = vmatprep.subr.msk.bf16.mxu1 %vm6840_vm5, %v6852_v61  ;;  %vm5962_vm5 = vcmp.eq.s32.totalorder %v884_v45, %v5735_v52  ;;  %v6906_v17 = vsel %vm5974_vm2, 4294967295, %v6905_v17 }
 0x1f9   :  { %vm6846_vm12 = vmpackc.low %vm5962_vm5, %vm5957_vm13  ;;  %v1127_v21 = vsel %vm6845_vm10, %v990_v18, %v1079_v1 }
 0x1ff   :  { %v830_v25 = vpop.permute.xlu0 %829  ;;  %v839_v26 = vpop.permute.xlu1 %838 }
 0x200   :  { %v5943_v27 = vsel %vm6841_vm6, %v824_v24, %v830_v25  ;;  %v1019_v24 = vsel %vm6847_vm11, %v5837_v22, 0.0 }
 0x201   :  { %v991_v2 = vsel %vm6847_vm11, %v5943_v27, 0.0  ;;  %v1039_v28 = vmul.f32 %v5943_v27, %v5943_v27 }
 0x202   :  { %v992_v31 = vrot.slane %v991_v2, 4 }
 0x203   :  { %v1080_v33 = vsel %vm6847_vm11, %v1039_v28, 0.0  ;;  %v832_v35 = vpop.permute.xlu1 %831  ;;  %v1020_v28 = vrot.slane %v1019_v24, 4  ;;  %v841_v32 = vpop.permute.xlu0 %840 }
 0x204   :  { %v993_v29 = vadd.f32 %v992_v31, %v991_v2  ;;  %v1081_v30 = vrot.slane %v1080_v33, 4  ;;  %v833_v43 = vsel %vm6841_vm6, %v830_v25, %v832_v35  ;;  %vm5967_vm6 = vcmp.eq.s32.totalorder %v887_v46, %v5457_v4 }
 0x205   :  { %v5954_v55 = vsel %vm6844_vm9, %v833_v43, %v839_v26  ;;  %v6904_v10 = vsel %vm5967_vm6, 4294967295, %v6903_v10  ;;  %vm6848_vm9 = vmpackc.low %vm5974_vm2, %vm5967_vm6 }
 0x206   :  { %v994_v38 = vrot.slane %v993_v29, 2  ;;  %v1082_v39 = vadd.f32 %v1081_v30, %v1080_v33  ;;  %v1040_v11 = vmul.f32 %v5954_v55, %v5954_v55  ;;  %v998_v2 = vsel %vm6847_vm11, %v5954_v55, 0.0 }
 0x207   :  { %v1109_v33 = vrot.slane %v1108_v3, 4  ;;  %v1021_v30 = vadd.f32 %v1020_v28, %v1019_v24 }
 0x208   :  { %v995_v41 = vadd.f32 %v994_v38, %v993_v29  ;;  %v1083_v42 = vrot.slane %v1082_v39, 2  ;;  %v1087_v25 = vsel %vm6847_vm11, %v1040_v11, 0.0  ;;  %v999_v29 = vrot.slane %v998_v2, 4 }
 0x209   :  { %v1088_v31 = vrot.slane %v1087_v25, 4  ;;  %v1110_v60 = vadd.f32 %v1109_v33, %v1108_v3  ;;  %v1022_v40 = vrot.slane %v1021_v30, 2 }
 0x20a   :  { %v996_v47 = vrot.slane %v995_v41, 1  ;;  %v1084_v54 = vadd.f32 %v1083_v42, %v1082_v39  ;;  %v1000_v36 = vadd.f32 %v999_v29, %v998_v2  ;;  %v1044_v42 = vmul.f32 %v5839_v23, %v5839_v23 }
 0x20b   :  { %v1089_v35 = vadd.f32 %v1088_v31, %v1087_v25  ;;  %v1023_v28 = vadd.f32 %v1022_v40, %v1021_v30  ;;  %v6913_v40 = vmov 0 }
 0x20c   :  { %v1085_v0 = vrot.slane %v1084_v54, 1  ;;  %v997_v13 = vadd.f32 %v996_v47, %v995_v41 }
 0x20d   :  { %v1090_v43 = vrot.slane %v1089_v35, 2 }
 0x20e   :  { %v1086_v16 = vadd.f32 %v1085_v0, %v1084_v54  ;;  %v1001_v0 = vrot.slane %v1000_v36, 2 }
 0x20f   :  { %v1091_v25 = vadd.f32 %v1090_v43, %v1089_v35 }
 0x210   :  { %v1128_v20 = vsel %vm6845_vm10, %v997_v13, %v1086_v16  ;;  %vm852_vm10 = vcmask 916480   ;;  %v872_v13 = vadd.s32 1024, %v5729_v50 }
 0x211   :  { %1347 = vmatprep.mubr.f32.mxu1 %v1128_v20 }
 0x212   :  { %1348 = vmatmul.mubr.f32.vlgmr.msra.gmra.mrb[8].mxu1 %v1127_v21 }
 0x213   :  { %4760 = vmatpush1.bf16.xpose.msk.msra.mxu1 %vm6846_vm12, %v6852_v61  ;;  %vm6907_vm12 = vcmask 785408  }
 0x214   :  { %4762 = vmatprep.subr.msk.bf16.mxu1 %vm6848_vm9, %v6852_v61  ;;  %v843_v37 = vsel %vm6907_vm12, %v839_v26, %v841_v32  ;;  %vm6908_vm9 = vcmask 1041408   ;;  %v1111_v26 = vrot.slane %v1110_v60, 2  ;;  %v1002_v32 = vadd.f32 %v1001_v0, %v1000_v36  ;;  %v6298_v0 = vld [vmem:[%s6832_s2 + $0xa8] sm:$0xff]  }
 0x215   :  { %vm6909_vm12 = vmmov %vm6908_vm9 }
 0x216   :  { %vm6910_vm11 = vmmov %vm6908_vm9  ;;  %v1112_v31 = vadd.f32 %v1111_v26, %v1110_v60 }
 0x218   :  { %v1113_v35 = vrot.slane %v1112_v31, 1 }
 0x21b   :  { %v849_v38 = vpop.permute.xlu0 %848 }
 0x21c   :  { %v6009_v39 = vsel %vm852_vm10, %v843_v37, %v849_v38  ;;  %v851_v41 = vpop.permute.xlu1 %850  ;;  %v886_v37 = vand.u32 15, %v872_v13 }
 0x21d   :  { %v1005_v44 = vsel %vm6908_vm9, %v6009_v39, 0.0  ;;  %v1041_v45 = vmul.f32 %v6009_v39, %v6009_v39  ;;  %v6017_v46 = vsel %vm852_vm10, %v849_v38, %v851_v41  ;;  %vm6911_vm10 = vcmask 123904  }
 0x21e   :  { %v1006_v47 = vrot.slane %v1005_v44, 4  ;;  %v1012_v54 = vsel %vm6909_vm12, %v6017_v46, 0.0  ;;  %v1042_v56 = vmul.f32 %v6017_v46, %v6017_v46  ;;  %v1027_v21 = vsel %vm6911_vm10, %v5839_v23, 0.0  ;;  %vm6912_vm6 = vmmov %vm6911_vm10 }
 0x21f   :  { %v1094_v1 = vsel %vm6910_vm11, %v1041_v45, 0.0  ;;  %v1013_v11 = vrot.slane %v1012_v54, 4  ;;  %v1115_v24 = vsel %vm6912_vm6, %v1044_v42, 0.0  ;;  %v1024_v42 = vrot.slane %v1023_v28, 1 }
 0x220   :  { %v1007_v16 = vadd.f32 %v1006_v47, %v1005_v44  ;;  %v1095_v18 = vrot.slane %v1094_v1, 4  ;;  %v1101_v19 = vsel %vm6908_vm9, %v1042_v56, 0.0  ;;  %v1028_v44 = vrot.slane %v1027_v21, 4 }
 0x221   :  { %v1102_v20 = vrot.slane %v1101_v19, 4  ;;  %v1014_v33 = vadd.f32 %v1013_v11, %v1012_v54  ;;  %v1116_v45 = vrot.slane %v1115_v24, 4  ;;  %v1092_v56 = vrot.slane %v1091_v25, 1 }
 0x222   :  { %v1008_v3 = vrot.slane %v1007_v16, 2  ;;  %v1096_v2 = vadd.f32 %v1095_v18, %v1094_v1  ;;  %v1003_v1 = vrot.slane %v1002_v32, 1  ;;  %v1029_v30 = vadd.f32 %v1028_v44, %v1027_v21 }
 0x223   :  { %v1103_v29 = vadd.f32 %v1102_v20, %v1101_v19  ;;  %v1015_v43 = vrot.slane %v1014_v33, 2  ;;  %v1117_v60 = vadd.f32 %v1116_v45, %v1115_v24  ;;  %vm6031_vm6 = vcmp.eq.s32.totalorder %v886_v37, %v5457_v4 }
 0x224   :  { %v1009_v38 = vadd.f32 %v1008_v3, %v1007_v16  ;;  %v1097_v41 = vrot.slane %v1096_v2, 2  ;;  %v6914_v40 = vsel %vm6031_vm6, 4294967295, %v6913_v40  ;;  %v1093_v54 = vadd.f32 %v1092_v56, %v1091_v25 }
 0x225   :  { %v1104_v47 = vrot.slane %v1103_v29, 2  ;;  %vm6036_vm11 = vcmp.eq.s32.totalorder %v886_v37, %v5735_v52  ;;  %v888_v11 = vand.u32 15, %v874_v12  ;;  %v1025_v18 = vadd.f32 %v1024_v42, %v1023_v28 }
 0x226   :  { %v1010_v61 = vrot.slane %v1009_v38, 1  ;;  %v1098_v63 = vadd.f32 %v1097_v41, %v1096_v2  ;;  %v1114_v19 = vadd.f32 %v1113_v35, %v1112_v31  ;;  %v1016_v20 = vadd.f32 %v1015_v43, %v1014_v33  ;;  %vm6857_vm9 = vmpackc.low %vm6036_vm11, %vm6031_vm6 }
 0x227   :  { %v1105_v26 = vadd.f32 %v1104_v47, %v1103_v29  ;;  %v1004_v21 = vadd.f32 %v1003_v1, %v1002_v32  ;;  %v1030_v24 = vrot.slane %v1029_v30, 2  ;;  %v1118_v3 = vrot.slane %v1117_v60, 2 }
 0x228   :  { %v1099_v36 = vrot.slane %v1098_v63, 1  ;;  %v1011_v13 = vadd.f32 %v1010_v61, %v1009_v38  ;;  %vm6917_vm12 = vcmask 1040384   ;;  %vm6047_vm2 = vcmp.eq.s32.totalorder %v888_v11, %v5457_v4 }
 0x229   :  { %vm6918_vm10 = vmmov %vm6917_vm12  ;;  %v1106_v29 = vrot.slane %v1105_v26, 1  ;;  %v6919_v12 = vmov 0  ;;  %vm6052_vm13 = vcmp.eq.s32.totalorder %v888_v11, %v5735_v52  ;;  %v6921_v61 = vmov 0  ;;  %v6085_v11 = vld [vmem:[%s6832_s2] sm:$0xff]  }
 0x22a   :  { %v1100_v16 = vadd.f32 %v1099_v36, %v1098_v63  ;;  %v1129_v25 = vsel %vm6918_vm10, %v1004_v21, %v1093_v54  ;;  %v6920_v12 = vsel %vm6047_vm2, 4294967295, %v6919_v12  ;;  %v6922_v61 = vsel %vm6052_vm13, 4294967295, %v6921_v61  ;;  %v6080_v54 = vld [vmem:[%s6832_s2 + $0x40] sm:$0xff]   ;;  %v6122_v21 = vld [vmem:[%s6832_s2 + $0x18] sm:$0xff]  }
 0x22b   :  { %v1017_v28 = vrot.slane %v1016_v20, 1  ;;  %v6924_v31 = vmov 1.0|1.0   ;;  %v6861_v32 = vmov 0.0|0.0   ;;  %v6925_v33 = vmov 0.0  }
 0x22c   :  { %v1130_v2 = vsel %vm6917_vm12, %v1011_v13, %v1100_v16  ;;  %vm6923_vm12 = vmmov %vm6918_vm10  ;;  %v3743_v37 = vsel %vm6047_vm2, 1.0, %v6925_v33  ;;  %v3754_v38 = vsel %vm6052_vm13, 1.0, %v6925_v33  ;;  %v1031_v41 = vadd.f32 %v1030_v24, %v1029_v30  ;;  %v6090_v13 = vld [vmem:[%s6832_s2 + $0x48] sm:$0xff]   ;;  %v6127_v24 = vld [vmem:[%s6832_s2 + $0x60] sm:$0xff]  }
 0x22d   :  { %1417 = vmatprep.mubr.f32.mxu1 %v1130_v2  ;;  %v1132_v63 = vsel %vm6923_vm12, %v1025_v18, %v1114_v19  ;;  %v1119_v44 = vadd.f32 %v1118_v3, %v1117_v60  ;;  %v1107_v45 = vadd.f32 %v1106_v29, %v1105_v26  ;;  %v1018_v47 = vadd.f32 %v1017_v28, %v1016_v20  ;;  %v6098_v16 = vld [vmem:[%s6832_s2 + $0x8] sm:$0xff]   ;;  %v6103_v18 = vld [vmem:[%s6832_s2 + $0x50] sm:$0xff]   ;;  %v6115_v20 = vld [vmem:[%s6832_s2 + $0x58] sm:$0xff]  }
 0x22e   :  { %1418 = vmatmul.mubr.f32.vlgmr.msra.gmra.mrb[8].mxu1 %v1129_v25  ;;  %v4766_v56 = vpack.c.bf16 %v3754_v38, %v3743_v37  ;;  %vm6926_vm10 = vcmask 130048   ;;  %v1032_v42 = vrot.slane %v1031_v41, 1  ;;  %vm5419_vm6 = vmmov 0   ;;  %v6110_v19 = vld [vmem:[%s6832_s2 + $0x10] sm:$0xff]   ;;  %v6134_v3 = vld [vmem:[%s6832_s2 + $0x20] sm:$0xff]   ;;  %v6139_v2 = vld [vmem:[%s6832_s2 + $0x68] sm:$0xff]  }
 0x22f   :  { %4764 = vmatpush1.bf16.xpose.msk.msra.mxu1 %vm6857_vm9, %v6924_v31  ;;  %1487 = vmatprep.mubr.f32.mxu1 %v1132_v63  ;;  %vm4767_vm12 = vmpackc.low %vm6926_vm10, %vm6926_vm10  ;;  %v1120_v35 = vrot.slane %v1119_v44, 1  ;;  %vm6927_vm9 = vcmask 1040384   ;;  %v6146_v25 = vld [vmem:[%s6832_s2 + $0x28] sm:$0xff]  }
 0x230   :  { %4765 = vmatprep.subr.bf16.mxu1 %v6861_v32  ;;  %v1131_v43 = vsel %vm6927_vm9, %v1018_v47, %v1107_v45  ;;  %v1033_v1 = vadd.f32 %v1032_v42, %v1031_v41  ;;  %vm6928_vm13 = vmmov %vm6927_vm9  ;;  %v6152_v42 = vld [vmem:[%s6834_s4] sm:$0xff] }
 0x231   :  { %v1121_v36 = vadd.f32 %v1120_v35, %v1119_v44  ;;  %vm6929_vm2 = vmmov %vm6926_vm10  ;;  %6930 = vst [vmem:[#allocation8_spill] sm:$0xff] %v6152_v42 }
 0x232   :  { %vm6933_vm10 = vmpackc.low %vm5819_vm8, %vm5814_vm7  ;;  %vm6938_vm7 = vnez %v6900_v7  ;;  %v6267_v7 = vld [vmem:[%s6832_s2 + $0xe0] sm:$0xff]  }
 0x233   :  { %v1133_v30 = vsel %vm6928_vm13, %v1033_v1, %v1121_v36  ;;  %vm6931_vm13 = vmmov %vm6927_vm9 }
 0x234   :  { %vm6932_vm9 = vmpackc.low %vm5790_vm4, %vm5785_vm3 }
 0x235   :  { %vm6936_vm3 = vmpackc.low %vm5912_vm1, %vm5905_vm0  ;;  %vm6944_vm1 = vnez %v6914_v40  ;;  %v6291_v40 = vld [vmem:[%s6832_s2 + $0xe8] sm:$0xff]  }
 0x236   :  { %1488 = vmatmul.mubr.f32.vlgmr.msra.gmra.mrb[8].mxu1 %v1131_v43  ;;  %vm6937_vm4 = vmmov %vm6929_vm2 }
 0x237   :  { %4768 = vmatpush3.bf16.xpose.msk.msra.mxu1 %vm4767_vm12, %v4766_v56  ;;  %4432 = vmatprep.mubr.msk.f32.mxu1 %vm5419_vm6, %v6925_v33  ;;  %vm6934_vm12 = vmmov %vm6929_vm2 }
 0x238   :  { %4793 = vmatprep.subr.bf16.mxu1 %v6080_v54  ;;  %vm6939_vm8 = vmpackc.low %vm5962_vm5, %vm6938_vm7  ;;  %vm6946_vm5 = vnez %v6920_v12  ;;  %v6304_v12 = vld [vmem:[%s6832_s2 + $0x78] sm:$0xff]  }
 0x239   :  { %vm6943_vm0 = vmmov %vm6937_vm4 }
 0x23e   :  { %4433 = vmatmul.mubr.msk.f32.vlgmr.msra.gmra.mrb[8].mxu1 %vm6929_vm2, %v1133_v30 }
 0x23f   :  { %4795 = vmatpush3.bf16.msra.mxu1 %v6085_v11 }
 0x240   :  { %4797 = vmatprep.subr.bf16.mxu1 %v6090_v13 }
 0x243   :  { %4799 = vmatpush3.bf16.msra.mxu1 %v6098_v16 }
 0x244   :  { %4801 = vmatprep.subr.bf16.mxu1 %v6103_v18 }
 0x247   :  { %4803 = vmatpush3.bf16.msra.mxu1 %v6110_v19 }
 0x248   :  { %4805 = vmatprep.subr.bf16.mxu1 %v6115_v20 }
 0x24b   :  { %4807 = vmatpush3.bf16.msra.mxu1 %v6122_v21 }
 0x24c   :  { %4809 = vmatprep.subr.bf16.mxu1 %v6127_v24 }
 0x24f   :  { %4811 = vmatpush3.bf16.msra.mxu1 %v6134_v3 }
 0x250   :  { %4813 = vmatprep.subr.bf16.mxu1 %v6139_v2 }
 0x253   :  { %4815 = vmatpush3.bf16.msra.mxu1 %v6146_v25 }
 0x2b1   :  { %v1209_v60 = vpop.f32.mrb[10].mxu0 }
 0x2b2   :  { %v1211_v26 = vpop.f32.mrb[11].mxu0 }
 0x2b3   :  { %v6315_v26 = vld [vmem:[%s6832_s2 + $0xf0] sm:$0xff]  }
 0x311   :  { %v1559_v29 = vpop.f32.mrb[8].mxu1 }
 0x312   :  { %v5169_v63 = vadd.f32 %v1559_v29, %v1209_v60  ;;  %v4434_v28 = vpop.f32.mrb[9].mxu1  ;;  %v6322_v29 = vld [vmem:[%s6832_s2 + $0xb0] sm:$0xff]  }
 0x313   :  { %v6335_v28 = vld [vmem:[%s6832_s2 + $0xb8] sm:$0xff]  }
 0x314   :  { %v1563_v37 = vmul.f32 0.0061728396, %v5169_v63  ;;  %v6329_v63 = vld [vmem:[%s6832_s2 + $0xf8] sm:$0xff]  }
 0x316   :  { %v1564_v38 = vmul.f32 %v1563_v37, %v1563_v37 }
 0x318   :  { %v1566_v41 = vrot.slane %v1564_v38, 7  ;;  %v6343_v38 = vsub.s32 1, %v5457_v4 }
 0x31a   :  { %v1568_v44 = vsub.f32 %v1563_v37, %v1566_v41 }
 0x31c   :  { %v1569_v45 = vmax.f32 %v1568_v44, 0.0 }
 0x31e   :  { %v1570_v47 = vadd.f32 1e-05, %v1569_v45 }
 0x320   :  { %5368 = vrsqrt.f32 %v1570_v47 }
 0x32a   :  { %v5369_v56 = vpop.eup %5368 }
 0x32b   :  { %v1573_v35 = vrot.slane %v5369_v56, 1 }
 0x32d   :  { %v1575_v43 = vmul.f32 %v1573_v35, %v6152_v42 }
 0x32f   :  { %v1576_v1 = vmul.f32 %v1575_v43, %v1563_v37  ;;  %v6340_v37 = vsub.s32 0, %v5457_v4 }
 0x331   :  { %v1578_v36 = vrot.slane %v1576_v1, 7 }
 0x333   :  { %v1580_v30 = vsub.f32 %v6152_v42, %v1578_v36 }
 0x335   :  { %v1581_v60 = vsel %vm6931_vm13, %v1575_v43, %v1580_v30  ;;  %vm6935_vm13 = vmpackc.low %vm5900_vm15, %vm5895_vm14  ;;  %vm6940_vm14 = vnez %v6906_v17  ;;  %vm6941_vm15 = vnez %v6904_v10  ;;  %v6280_v10 = vld [vmem:[%s6832_s2 + $0x70] sm:$0xff]  }
 0x336   :  { %3782 = vmatmul.mubr.msk.f32.vlgmr.msra.gmra.mrb[12].mxu0 %vm6929_vm2, %v1581_v60  ;;  %vm6942_vm2 = vmpackc.low %vm6940_vm14, %vm6941_vm15  ;;  %4817 = vmatprep.subr.bf16.mxu1 %v6280_v10  ;;  %v6286_v17 = vld [vmem:[%s6832_s2 + $0x30] sm:$0xff]  }
 0x337   :  { %4776 = vmatpush1.bf16.msk.msra.mxu0 %vm6932_vm9, %v6924_v31  ;;  %1720 = vmatprep.mubr.f32.mxu0 %v6925_v33  ;;  %vm6945_vm9 = vmpackc.low %vm6036_vm11, %vm6944_vm1 }
 0x338   :  { %4778 = vmatprep.subr.msk.bf16.mxu0 %vm6933_vm10, %v6924_v31  ;;  %vm6947_vm10 = vnez %v6922_v61  ;;  %vm6949_vm11 = vmmov %vm6943_vm0  ;;  %4819 = vmatpush3.bf16.msra.mxu1 %v6286_v17  ;;  %v6310_v61 = vld [vmem:[%s6832_s2 + $0x38] sm:$0xff]  }
 0x339   :  { %4821 = vmatprep.subr.bf16.mxu1 %v6304_v12 }
 0x33a   :  { %3787 = vmatmul.mubr.msk.f32.vlgmr.msra.gmra.mrb[14].mxu0 %vm6934_vm12, %v1581_v60  ;;  %vm4790_vm12 = vmpackc.low %vm6947_vm10, %vm6946_vm5 }
 0x33b   :  { %4780 = vmatpush1.bf16.msk.msra.mxu0 %vm6935_vm13, %v6924_v31  ;;  %1791 = vmatprep.mubr.f32.mxu0 %v6925_v33  ;;  %vm6948_vm13 = vmmov %vm6943_vm0 }
 0x33c   :  { %4782 = vmatprep.subr.msk.bf16.mxu0 %vm6936_vm3, %v6924_v31  ;;  %4823 = vmatpush3.bf16.msra.mxu1 %v6310_v61  ;;  %vm6951_vm3 = vcmask 654336  }
 0x33d   :  { %4856 = vmatprep.subr.bf16.mxu1 %v6861_v32 }
 0x33e   :  { %3792 = vmatmul.mubr.msk.f32.vlgmr.msra.gmra.mrb[16].mxu0 %vm6937_vm4, %v1581_v60  ;;  %vm6952_vm4 = vcmask 785408  }
 0x33f   :  { %4784 = vmatpush1.bf16.msk.msra.mxu0 %vm6939_vm8, %v6924_v31  ;;  %1862 = vmatprep.mubr.f32.mxu0 %v6925_v33  ;;  %vm6953_vm7 = vmmov %vm6952_vm4 }
 0x340   :  { %4786 = vmatprep.subr.msk.bf16.mxu0 %vm6942_vm2, %v6924_v31  ;;  %vm6954_vm8 = vmmov %vm6951_vm3  ;;  %vm6957_vm2 = vcmask 523264  }
 0x341   :  { %vm6955_vm14 = vmmov %vm6952_vm4 }
 0x342   :  { %3797 = vmatmul.mubr.msk.f32.vlgmr.msra.gmra.mrb[18].mxu0 %vm6943_vm0, %v1581_v60  ;;  %vm6956_vm15 = vmmov %vm6952_vm4 }
 0x343   :  { %4788 = vmatpush1.bf16.msk.msra.mxu0 %vm6945_vm9, %v6924_v31  ;;  %1933 = vmatprep.mubr.f32.mxu0 %v6925_v33  ;;  %vm6958_vm0 = vmmov %vm6951_vm3 }
 0x344   :  { %4789 = vmatprep.subr.bf16.mxu0 %v6861_v32  ;;  %vm6959_vm1 = vmmov %vm6952_vm4 }
 0x345   :  { %vm6960_vm9 = vmmov %vm6957_vm2 }
 0x346   :  { %3802 = vmatmul.mubr.msk.f32.vlgmr.msra.gmra.mrb[20].mxu0 %vm6948_vm13, %v1581_v60  ;;  %vm6961_vm5 = vmmov %vm6957_vm2 }
 0x347   :  { %4791 = vmatpush3.bf16.msk.msra.mxu0 %vm4790_vm12, %v6924_v31  ;;  %4439 = vmatprep.mubr.msk.f32.mxu0 %vm5419_vm6, %v6925_v33  ;;  %vm6962_vm10 = vmmov %vm6957_vm2 }
 0x348   :  { %4825 = vmatprep.subr.bf16.mxu0 %v6215_v5  ;;  %vm6963_vm12 = vmmov %vm6957_vm2 }
 0x349   :  { %vm6964_vm13 = vmmov %vm6957_vm2 }
 0x34a   :  { %4440 = vmatmul.mubr.msk.f32.vlgmr.msra.gmra.mrb[22].mxu0 %vm6949_vm11, %v1581_v60 }
 0x34b   :  { %4827 = vmatpush3.bf16.msra.mxu0 %v6225_v6 }
 0x34c   :  { %4829 = vmatprep.subr.bf16.mxu0 %v6230_v14 }
 0x34f   :  { %4831 = vmatpush3.bf16.msra.mxu0 %v6238_v15 }
 0x350   :  { %4833 = vmatprep.subr.bf16.mxu0 %v6243_v57 }
 0x353   :  { %4835 = vmatpush3.bf16.msra.mxu0 %v6250_v58 }
 0x354   :  { %4837 = vmatprep.subr.bf16.mxu0 %v6255_v62 }
 0x357   :  { %4839 = vmatpush3.bf16.msra.mxu0 %v6262_v8 }
 0x358   :  { %4841 = vmatprep.subr.bf16.mxu0 %v6267_v7 }
 0x35b   :  { %4843 = vmatpush3.bf16.msra.mxu0 %v6274_v9 }
 0x35c   :  { %4845 = vmatprep.subr.bf16.mxu0 %v6291_v40 }
 0x35f   :  { %4847 = vmatpush3.bf16.msra.mxu0 %v6298_v0 }
 0x360   :  { %4849 = vmatprep.subr.bf16.mxu0 %v6315_v26 }
 0x363   :  { %4851 = vmatpush3.bf16.msra.mxu0 %v6322_v29 }
 0x364   :  { %4853 = vmatprep.subr.bf16.mxu0 %v6329_v63 }
 0x367   :  { %4855 = vmatpush3.bf16.msra.mxu0 %v6335_v28 }
 0x368   :  { %4896 = vmatprep.subr.bf16.mxu0 %v6080_v54 }
 0x409   :  { %v1651_v41 = vpop.f32.mrb[12].mxu0 }
 0x40a   :  { %v2013_v44 = vrot.slane %v1651_v41, %v6340_v37  ;;  %v1653_v45 = vpop.f32.mrb[13].mxu0  ;;  %v2068_v35 = vrot.slane %v1651_v41, %v6343_v38 }
 0x40b   :  { %v2017_v47 = vrot.slane %v1653_v45, %v6340_v37  ;;  %v2072_v1 = vrot.slane %v1653_v45, %v6343_v38 }
 0x40c   :  { %v2054_v56 = vmul.f32 %v2013_v44, %v5724_v48 }
 0x40d   :  { %v2055_v43 = vmul.f32 %v2017_v47, %v5848_v34  ;;  %v1722_v36 = vpop.f32.mrb[14].mxu0 }
 0x40e   :  { %v2109_v30 = vadd.f32 %v2068_v35, %v2054_v56  ;;  %v2021_v60 = vrot.slane %v1722_v36, %v6340_v37  ;;  %v1724_v32 = vpop.f32.mrb[15].mxu0  ;;  %v2076_v4 = vrot.slane %v1722_v36, %v6343_v38 }
 0x40f   :  { %v2110_v42 = vadd.f32 %v2072_v1, %v2055_v43  ;;  %v2025_v31 = vrot.slane %v1724_v32, %v6340_v37  ;;  %v2080_v41 = vrot.slane %v1724_v32, %v6343_v38  ;;  %v6361_v43 = vld [vmem:[%s6832_s2 + $0x100] sm:$0xff]  }
 0x410   :  { %v2056_v52 = vmul.f32 %v2021_v60, %v5857_v53  ;;  %v2120_v47 = vmax.f32 %v2109_v30, 0.0 }
 0x411   :  { %v2057_v48 = vmul.f32 %v2025_v31, %v5881_v59  ;;  %v1793_v44 = vpop.f32.mrb[16].mxu0  ;;  %v2121_v34 = vmax.f32 %v2110_v42, 0.0 }
 0x412   :  { %v2111_v45 = vadd.f32 %v2076_v4, %v2056_v52  ;;  %v2029_v56 = vrot.slane %v1793_v44, %v6340_v37  ;;  %v1795_v35 = vpop.f32.mrb[17].mxu0  ;;  %v2084_v31 = vrot.slane %v1793_v44, %v6343_v38 }
 0x413   :  { %v2112_v1 = vadd.f32 %v2080_v41, %v2057_v48  ;;  %v2033_v53 = vrot.slane %v1795_v35, %v6340_v37  ;;  %2378 = vmatprep.mubr.f32.mxu1 %v2121_v34  ;;  %v2088_v52 = vrot.slane %v1795_v35, %v6343_v38  ;;  %v6950_v41 = vmov 0.0|0.0  }
 0x414   :  { %v2058_v59 = vmul.f32 %v2029_v56, %v5892_v49  ;;  %2379 = vmatmul.mubr.f32.vlgmr.msra.gmra.mrb[10].mxu1 %v2120_v47  ;;  %v2122_v32 = vmax.f32 %v2111_v45, 0.0  ;;  %v6375_v49 = vld [vmem:[%s6832_s2 + $0x108] sm:$0xff]  }
 0x415   :  { %v2059_v4 = vmul.f32 %v2033_v53, %v5943_v27  ;;  %4858 = vmatpush1.bf16.msra.mxu1 %v6361_v43  ;;  %v1864_v42 = vpop.f32.mrb[18].mxu0  ;;  %v2123_v36 = vmax.f32 %v2112_v1, 0.0 }
 0x416   :  { %v2113_v30 = vadd.f32 %v2084_v31, %v2058_v59  ;;  %v2037_v60 = vrot.slane %v1864_v42, %v6340_v37  ;;  %2529 = vrot.lane.b32.xlu1 %v2122_v32, %s5416_s6  ;;  %v1866_v48 = vpop.f32.mrb[19].mxu0  ;;  %4859 = vmatprep.subr.bf16.mxu1 %v6950_v41  ;;  %v2092_v45 = vrot.slane %v1864_v42, %v6343_v38 }
 0x417   :  { %v2114_v27 = vadd.f32 %v2088_v52, %v2059_v4  ;;  %v2041_v44 = vrot.slane %v1866_v48, %v6340_v37  ;;  %2448 = vmatprep.mubr.f32.mxu0 %v2123_v36  ;;  %v2096_v1 = vrot.slane %v1866_v48, %v6343_v38 }
 0x418   :  { %v6378_v34 = vmax.f32 %v2113_v30, 0.0  ;;  %v2060_v47 = vmul.f32 %v2037_v60, %v5954_v55  ;;  %2449 = vmatmul.mubr.f32.vlgmr.msra.gmra.mrb[24].mxu0 %v2122_v32  ;;  %v6391_v55 = vld [vmem:[%s6832_s2 + $0x110] sm:$0xff]  }
 0x419   :  { %v2125_v56 = vmax.f32 %v2114_v27, 0.0  ;;  %v2061_v35 = vmul.f32 %v2041_v44, %v6009_v39  ;;  %4861 = vmatpush1.bf16.msra.mxu1 %v6375_v49  ;;  %v1935_v53 = vpop.f32.mrb[20].mxu0  ;;  %4898 = vmatpush3.bf16.msra.mxu0 %v6085_v11 }
 0x41a   :  { %v2115_v59 = vadd.f32 %v2092_v45, %v2060_v47  ;;  %v2045_v31 = vrot.slane %v1935_v53, %v6340_v37  ;;  %v1937_v4 = vpop.f32.mrb[21].mxu0  ;;  %4862 = vmatprep.subr.bf16.mxu1 %v6950_v41  ;;  %v5326_v39 = vpack.i.bf16 %v6378_v34, %v2123_v36  ;;  %4900 = vmatprep.subr.bf16.mxu0 %v6090_v13 }
 0x41b   :  { %v2116_v32 = vadd.f32 %v2096_v1, %v2061_v35  ;;  %v2049_v52 = vrot.slane %v1937_v4, %v6340_v37  ;;  %3806 = vmatprep.mubr.msk.f32.mxu1 %vm6951_vm3, %v2125_v56  ;;  %v2100_v60 = vrot.slane %v1935_v53, %v6343_v38  ;;  %v2104_v27 = vrot.slane %v1937_v4, %v6343_v38 }
 0x41c   :  { %v2126_v42 = vmax.f32 %v2115_v59, 0.0  ;;  %v2062_v30 = vmul.f32 %v2045_v31, %v6017_v46  ;;  %5327 = vrot.lane.b32.xlu0 %v5326_v39, %s5416_s6  ;;  %v6409_v46 = vld [vmem:[%s6832_s2 + $0x118] sm:$0xff]  }
 0x41d   :  { %v2063_v48 = vmul.f32 %v2049_v52, %v5837_v22  ;;  %4864 = vmatpush1.bf16.msra.mxu1 %v6391_v55  ;;  %v2006_v36 = vpop.f32.mrb[22].mxu0  ;;  %v2127_v44 = vmax.f32 %v2116_v32, 0.0  ;;  %4902 = vmatpush3.bf16.msra.mxu0 %v6098_v16  ;;  %v6434_v32 = vld [vmem:[%s6832_s2 + $0x128] sm:$0xff]   ;;  %v6445_v52 = vld [vmem:[%s6832_s2 + $0x130] sm:$0xff]  }
 0x41e   :  { %v2117_v47 = vadd.f32 %v2100_v60, %v2062_v30  ;;  %v2053_v45 = vrot.slane %v2006_v36, %v6340_v37  ;;  %v4441_v35 = vpop.f32.mrb[23].mxu0  ;;  %4865 = vmatprep.subr.bf16.mxu1 %v6950_v41  ;;  %v5331_v22 = vpack.i.bf16 %v2126_v42, %v2125_v56  ;;  %4904 = vmatprep.subr.bf16.mxu0 %v6103_v18  ;;  %v6422_v56 = vld [vmem:[%s6832_s2 + $0x120] sm:$0xff]   ;;  %v6455_v30 = vld [vmem:[%s6832_s2 + $0x138] sm:$0xff]  }
 0x41f   :  { %v2118_v1 = vadd.f32 %v2104_v27, %v2063_v48  ;;  %2539 = vrot.lane.b32.xlu1 %v2127_v44, %s5416_s6  ;;  %v2108_v31 = vrot.slane %v2006_v36, %v6343_v38  ;;  %v6464_v60 = vld [vmem:[%s6832_s2 + $0x140] sm:$0xff]   ;;  %v6473_v48 = vld [vmem:[%s6832_s2 + $0x148] sm:$0xff]   ;;  %v6481_v27 = vld [vmem:[%s6832_s2 + $0x150] sm:$0xff]  }
 0x420   :  { %v2128_v53 = vmax.f32 %v2117_v47, 0.0  ;;  %v2064_v59 = vmul.f32 %v2053_v45, %v5839_v23  ;;  %5332 = vrot.lane.b32.xlu0 %v5331_v22, %s5416_s6  ;;  %v6488_v36 = vld [vmem:[%s6832_s2 + $0x158] sm:$0xff]  }
 0x421   :  { %4867 = vmatpush1.bf16.msra.mxu1 %v6409_v46  ;;  %4906 = vmatpush3.bf16.msra.mxu0 %v6110_v19  ;;  %v2129_v23 = vmax.f32 %v2118_v1, 0.0 }
 0x422   :  { %v2119_v4 = vadd.f32 %v2108_v31, %v2064_v59  ;;  %4868 = vmatprep.subr.bf16.mxu1 %v6950_v41  ;;  %v5341_v39 = vpack.i.bf16 %v2128_v53, %v2127_v44  ;;  %4908 = vmatprep.subr.bf16.mxu0 %v6115_v20  ;;  %v6495_v44 = vld [vmem:[%s6832_s2 + $0x160] sm:$0xff]  }
 0x423   :  { %2766 = vrot.lane.b32.xlu1 %v6378_v34, %s5415_s30 }
 0x424   :  { %5337 = vrot.lane.b32.xlu0 %v5331_v22, %s5415_s30  ;;  %v2130_v42 = vmax.f32 %v2119_v4, 0.0 }
 0x425   :  { %4870 = vmatpush1.bf16.msra.mxu1 %v6422_v56  ;;  %4910 = vmatpush3.bf16.msra.mxu0 %v6122_v21 }
 0x426   :  { %4871 = vmatprep.subr.bf16.mxu1 %v6950_v41  ;;  %4912 = vmatprep.subr.bf16.mxu0 %v6127_v24 }
 0x427   :  { %2776 = vrot.lane.b32.xlu1 %v2129_v23, %s5415_s30 }
 0x428   :  { %5342 = vrot.lane.b32.xlu0 %v5341_v39, %s5415_s30 }
 0x429   :  { %4873 = vmatpush1.bf16.msra.mxu1 %v6434_v32  ;;  %4914 = vmatpush3.bf16.msra.mxu0 %v6134_v3 }
 0x42a   :  { %4874 = vmatprep.subr.bf16.mxu1 %v6950_v41  ;;  %4916 = vmatprep.subr.bf16.mxu0 %v6139_v2 }
 0x42c   :  { %2778 = vrot.lane.b32.xlu0 %v2130_v42, %s5415_s30 }
 0x42d   :  { %4876 = vmatpush1.bf16.msra.mxu1 %v6445_v52  ;;  %4918 = vmatpush3.bf16.msra.mxu0 %v6146_v25 }
 0x42e   :  { %4877 = vmatprep.subr.bf16.mxu1 %v6950_v41  ;;  %4920 = vmatprep.subr.bf16.mxu0 %v6280_v10 }
 0x431   :  { %4879 = vmatpush1.bf16.msra.mxu1 %v6455_v30  ;;  %4922 = vmatpush3.bf16.msra.mxu0 %v6286_v17 }
 0x432   :  { %4880 = vmatprep.subr.bf16.mxu1 %v6950_v41  ;;  %4924 = vmatprep.subr.bf16.mxu0 %v6304_v12 }
 0x435   :  { %4882 = vmatpush1.bf16.msra.mxu1 %v6464_v60  ;;  %4926 = vmatpush3.bf16.msra.mxu0 %v6310_v61 }
 0x436   :  { %4883 = vmatprep.subr.bf16.mxu1 %v6950_v41  ;;  %4928 = vmatprep.subr.bf16.mxu0 %v6215_v5 }
 0x439   :  { %4885 = vmatpush1.bf16.msra.mxu1 %v6473_v48 }
 0x43a   :  { %4886 = vmatprep.subr.bf16.mxu1 %v6950_v41 }
 0x43d   :  { %4888 = vmatpush1.bf16.msra.mxu1 %v6481_v27 }
 0x43e   :  { %4889 = vmatprep.subr.bf16.mxu1 %v6950_v41 }
 0x441   :  { %4891 = vmatpush1.bf16.msra.mxu1 %v6488_v36 }
 0x442   :  { %4892 = vmatprep.subr.bf16.mxu1 %v6950_v41 }
 0x445   :  { %4894 = vmatpush1.bf16.msra.mxu1 %v6495_v44 }
 0x446   :  { %4959 = vmatprep.subr.bf16.mxu1 %v6950_v41 }
 0x448   :  { %2519 = vmatmul.mubr.f32.vlgmr.msra.gmra.mrb[12].mxu1 %v6378_v34 }
 0x449   :  { %4961 = vmatpush1.bf16.msra.mxu1 %v6361_v43 }
 0x44a   :  { %4962 = vmatprep.subr.bf16.mxu1 %v6950_v41 }
 0x44d   :  { %4964 = vmatpush1.bf16.msra.mxu1 %v6375_v49 }
 0x44e   :  { %4965 = vmatprep.subr.bf16.mxu1 %v6950_v41 }
 0x451   :  { %4967 = vmatpush1.bf16.msra.mxu1 %v6391_v55 }
 0x452   :  { %4968 = vmatprep.subr.bf16.mxu1 %v6950_v41 }
 0x455   :  { %4970 = vmatpush1.bf16.msra.mxu1 %v6409_v46 }
 0x456   :  { %4971 = vmatprep.subr.bf16.mxu1 %v6950_v41 }
 0x459   :  { %4973 = vmatpush1.bf16.msra.mxu1 %v6422_v56 }
 0x45a   :  { %4974 = vmatprep.subr.bf16.mxu1 %v6950_v41 }
 0x45d   :  { %4976 = vmatpush1.bf16.msra.mxu1 %v6434_v32 }
 0x45e   :  { %4977 = vmatprep.subr.bf16.mxu1 %v6950_v41 }
 0x461   :  { %4979 = vmatpush1.bf16.msra.mxu1 %v6445_v52 }
 0x462   :  { %4980 = vmatprep.subr.bf16.mxu1 %v6950_v41 }
 0x465   :  { %4982 = vmatpush1.bf16.msra.mxu1 %v6455_v30 }
 0x466   :  { %4983 = vmatprep.subr.bf16.mxu1 %v6950_v41 }
 0x469   :  { %4985 = vmatpush1.bf16.msra.mxu1 %v6464_v60 }
 0x46a   :  { %4986 = vmatprep.subr.bf16.mxu1 %v6950_v41 }
 0x46d   :  { %4988 = vmatpush1.bf16.msra.mxu1 %v6473_v48 }
 0x46e   :  { %4989 = vmatprep.subr.bf16.mxu1 %v6950_v41 }
 0x471   :  { %4991 = vmatpush1.bf16.msra.mxu1 %v6481_v27 }
 0x472   :  { %4992 = vmatprep.subr.bf16.mxu1 %v6950_v41 }
 0x475   :  { %4994 = vmatpush1.bf16.msra.mxu1 %v6488_v36 }
 0x476   :  { %4995 = vmatprep.subr.bf16.mxu1 %v6950_v41 }
 0x479   :  { %4997 = vmatpush1.bf16.msra.mxu1 %v6495_v44 }
 0x47a   :  { %5062 = vmatprep.subr.bf16.mxu1 %v6950_v41 }
 0x488   :  { %v2530_v34 = vpop.permute.xlu1 %2529 }
 0x48e   :  { %v5328_v47 = vpop.permute.xlu0 %5327 }
 0x48f   :  { %v5330_v45 = vunpack.i.h.bf16 %v5328_v47  ;;  %v5329_v35 = vunpack.i.l.bf16 %v5328_v47 }
 0x491   :  { %v2540_v22 = vpop.permute.xlu1 %2539  ;;  %v2542_v1 = vsel %vm6952_vm4, %v5329_v35, %v5330_v45  ;;  %v2541_v53 = vsel %vm6953_vm7, %v2530_v34, %v5329_v35 }
 0x492   :  { %2617 = vmatprep.mubr.f32.mxu0 %v2542_v1  ;;  %v5333_v59 = vpop.permute.xlu0 %5332  ;;  %3807 = vmatprep.mubr.msk.f32.mxu1 %vm6954_vm8, %v2540_v22 }
 0x493   :  { %v5335_v31 = vunpack.i.h.bf16 %v5333_v59  ;;  %v5334_v4 = vunpack.i.l.bf16 %v5333_v59  ;;  %2618 = vmatmul.mubr.f32.vlgmr.msra.gmra.mrb[26].mxu0 %v2541_v53 }
 0x494   :  { %4930 = vmatpush3.bf16.msra.mxu0 %v6225_v6 }
 0x495   :  { %4932 = vmatprep.subr.bf16.mxu0 %v6230_v14  ;;  %v2544_v39 = vsel %vm6955_vm14, %v5334_v4, %v5335_v31  ;;  %v2545_v23 = vsel %vm6956_vm15, %v5335_v31, %v2540_v22  ;;  %v6536_v34 = vpop.permute.xlu1 %2766 }
 0x496   :  { %v6533_v42 = vpop.permute.xlu0 %5337  ;;  %2687 = vmatprep.mubr.f32.mxu0 %v2544_v39  ;;  %2758 = vmatmul.mubr.f32.vlgmr.msra.gmra.mrb[14].mxu1 %v2545_v23 }
 0x497   :  { %5064 = vmatpush1.bf16.msra.mxu1 %v6361_v43 }
 0x498   :  { %4934 = vmatpush3.bf16.msra.mxu0 %v6238_v15  ;;  %5065 = vmatprep.subr.bf16.mxu1 %v6950_v41 }
 0x499   :  { %4936 = vmatprep.subr.bf16.mxu0 %v6243_v57  ;;  %v2777_v35 = vpop.permute.xlu1 %2776 }
 0x49a   :  { %v6541_v47 = vpop.permute.xlu0 %5342 }
 0x49b   :  { %5067 = vmatpush1.bf16.msra.mxu1 %v6375_v49  ;;  %v5340_v49 = vunpack.i.h.bf16 %v6533_v42 }
 0x49c   :  { %4938 = vmatpush3.bf16.msra.mxu0 %v6250_v58  ;;  %5068 = vmatprep.subr.bf16.mxu1 %v6950_v41 }
 0x49d   :  { %4940 = vmatprep.subr.bf16.mxu0 %v6255_v62 }
 0x49e   :  { %v2779_v43 = vpop.permute.xlu0 %2778 }
 0x49f   :  { %5070 = vmatpush1.bf16.msra.mxu1 %v6391_v55  ;;  %v2785_v22 = vsel %vm6957_vm2, %v2777_v35, %v2779_v43  ;;  %v5339_v55 = vunpack.i.l.bf16 %v6533_v42 }
 0x4a0   :  { %4942 = vmatpush3.bf16.msra.mxu0 %v6262_v8  ;;  %3808 = vmatprep.mubr.msk.f32.mxu1 %vm6958_vm0, %v2785_v22 }
 0x4a1   :  { %5071 = vmatprep.subr.bf16.mxu1 %v6950_v41  ;;  %4944 = vmatprep.subr.bf16.mxu0 %v6267_v7 }
 0x4a3   :  { %5073 = vmatpush1.bf16.msra.mxu1 %v6409_v46  ;;  %v2543_v46 = vsel %vm6959_vm1, %v5330_v45, %v5334_v4 }
 0x4a4   :  { %4946 = vmatpush3.bf16.msra.mxu0 %v6274_v9  ;;  %5074 = vmatprep.subr.bf16.mxu1 %v6950_v41 }
 0x4a5   :  { %4948 = vmatprep.subr.bf16.mxu0 %v6291_v40 }
 0x4a7   :  { %5076 = vmatpush1.bf16.msra.mxu1 %v6422_v56  ;;  %v2781_v56 = vsel %vm6960_vm9, %v5339_v55, %v5340_v49 }
 0x4a8   :  { %4950 = vmatpush3.bf16.msra.mxu0 %v6298_v0  ;;  %5077 = vmatprep.subr.bf16.mxu1 %v6950_v41 }
 0x4a9   :  { %4952 = vmatprep.subr.bf16.mxu0 %v6315_v26 }
 0x4ab   :  { %5079 = vmatpush1.bf16.msra.mxu1 %v6434_v32  ;;  %v3015_v32 = vand.u32 31, %v5729_v50 }
 0x4ac   :  { %4954 = vmatpush3.bf16.msra.mxu0 %v6322_v29  ;;  %5080 = vmatprep.subr.bf16.mxu1 %v6950_v41 }
 0x4ad   :  { %4956 = vmatprep.subr.bf16.mxu0 %v6329_v63 }
 0x4af   :  { %5082 = vmatpush1.bf16.msra.mxu1 %v6445_v52  ;;  %v6965_v52 = vld [vmem:[#allocation5_spill] sm:$0xff] }
 0x4b0   :  { %4958 = vmatpush3.bf16.msra.mxu0 %v6335_v28  ;;  %5083 = vmatprep.subr.bf16.mxu1 %v6950_v41  ;;  %vm3018_vm7 = vcmp.eq.s32.totalorder %v3015_v32, %v6965_v52  ;;  %v6639_v50 = vadd.s32 16, %v6965_v52 }
 0x4b1   :  { %4999 = vmatprep.subr.bf16.mxu0 %v6080_v54  ;;  %v5345_v54 = vunpack.i.h.bf16 %v6541_v47 }
 0x4b2   :  { %vm3024_vm1 = vcmp.eq.s32.totalorder %v3015_v32, %v6639_v50 }
 0x4b3   :  { %2688 = vmatmul.mubr.f32.vlgmr.msra.gmra.mrb[28].mxu0 %v2543_v46  ;;  %5085 = vmatpush1.bf16.msra.mxu1 %v6455_v30  ;;  %v6966_v30 = vld [vmem:[#allocation6_spill] sm:$0xff] }
 0x4b4   :  { %5001 = vmatpush3.bf16.msra.mxu0 %v6085_v11  ;;  %2857 = vmatprep.mubr.f32.mxu0 %v2781_v56  ;;  %v2784_v11 = vsel %vm6961_vm5, %v5345_v54, %v2777_v35  ;;  %vm3021_vm8 = vcmp.eq.s32.totalorder %v3015_v32, %v6966_v30 }
 0x4b5   :  { %5086 = vmatprep.subr.bf16.mxu1 %v6950_v41  ;;  %5003 = vmatprep.subr.bf16.mxu0 %v6090_v13  ;;  %v5344_v13 = vunpack.i.l.bf16 %v6541_v47  ;;  %vm5103_vm14 = vmpackc.low %vm3021_vm8, %vm3018_vm7 }
 0x4b7   :  { %5088 = vmatpush1.bf16.msra.mxu1 %v6464_v60  ;;  %v6967_v60 = vmov 1.0|1.0  }
 0x4b8   :  { %5005 = vmatpush3.bf16.msra.mxu0 %v6098_v16  ;;  %5089 = vmatprep.subr.bf16.mxu1 %v6950_v41  ;;  %v2780_v16 = vsel %vm6962_vm10, %v6536_v34, %v5339_v55 }
 0x4b9   :  { %5007 = vmatprep.subr.bf16.mxu0 %v6103_v18  ;;  %v2783_v18 = vsel %vm6963_vm12, %v5344_v13, %v5345_v54 }
 0x4bb   :  { %5091 = vmatpush1.bf16.msra.mxu1 %v6473_v48  ;;  %v6642_v48 = vadd.s32 24, %v6965_v52 }
 0x4bc   :  { %5009 = vmatpush3.bf16.msra.mxu0 %v6110_v19  ;;  %5092 = vmatprep.subr.bf16.mxu1 %v6950_v41 }
 0x4bd   :  { %5011 = vmatprep.subr.bf16.mxu0 %v6115_v20  ;;  %vm3027_vm9 = vcmp.eq.s32.totalorder %v3015_v32, %v6642_v48 }
 0x4be   :  { %vm5107_vm12 = vmpackc.low %vm3027_vm9, %vm3024_vm1  ;;  %vm6976_vm1 = vcmask 261120  }
 0x4bf   :  { %5094 = vmatpush1.bf16.msra.mxu1 %v6481_v27  ;;  %vm6698_vm9 = vmpackc.low %vm6976_vm1, %vm6976_vm1 }
 0x4c0   :  { %5013 = vmatpush3.bf16.msra.mxu0 %v6122_v21  ;;  %5095 = vmatprep.subr.bf16.mxu1 %v6950_v41 }
 0x4c1   :  { %5015 = vmatprep.subr.bf16.mxu0 %v6127_v24 }
 0x4c3   :  { %5097 = vmatpush1.bf16.msra.mxu1 %v6488_v36  ;;  %v6968_v36 = vld [vmem:[#allocation7_spill] sm:$0xff] }
 0x4c4   :  { %5017 = vmatpush3.bf16.msra.mxu0 %v6134_v3  ;;  %5098 = vmatprep.subr.bf16.mxu1 %v6950_v41 }
 0x4c5   :  { %5019 = vmatprep.subr.bf16.mxu0 %v6139_v2 }
 0x4c7   :  { %5100 = vmatpush1.bf16.msra.mxu1 %v6495_v44  ;;  %v6645_v44 = vand.u32 31, %v6968_v36 }
 0x4c8   :  { %5021 = vmatpush3.bf16.msra.mxu0 %v6146_v25 }
 0x4c9   :  { %5023 = vmatprep.subr.bf16.mxu0 %v6280_v10  ;;  %vm3026_vm5 = vcmp.eq.s32.totalorder %v6645_v44, %v6639_v50  ;;  %vm3029_vm10 = vcmp.eq.s32.totalorder %v6645_v44, %v6642_v48 }
 0x4ca   :  { %2998 = vmatmul.mubr.f32.vlgmr.msra.gmra.mrb[16].mxu1 %v2784_v11  ;;  %v3820_v36 = vsel %vm3029_vm10, 1.0, %v6925_v33 }
 0x4cb   :  { %3350 = vmatprep.mubr.f32.mxu1 %v6925_v33 }
 0x4cc   :  { %5025 = vmatpush3.bf16.msra.mxu0 %v6286_v17 }
 0x4cd   :  { %5027 = vmatprep.subr.bf16.mxu0 %v6304_v12 }
 0x4d0   :  { %5029 = vmatpush3.bf16.msra.mxu0 %v6310_v61 }
 0x4d1   :  { %5031 = vmatprep.subr.bf16.mxu0 %v6215_v5  ;;  %v2782_v5 = vsel %vm6964_vm13, %v5340_v49, %v5344_v13  ;;  %vm6969_vm13 = vcmask 785408  }
 0x4d3   :  { %2858 = vmatmul.mubr.f32.vlgmr.msra.gmra.mrb[30].mxu0 %v2780_v16 }
 0x4d4   :  { %5033 = vmatpush3.bf16.msra.mxu0 %v6225_v6  ;;  %2927 = vmatprep.mubr.f32.mxu0 %v2783_v18 }
 0x4d5   :  { %5035 = vmatprep.subr.bf16.mxu0 %v6230_v14 }
 0x4d8   :  { %5037 = vmatpush3.bf16.msra.mxu0 %v6238_v15 }
 0x4d9   :  { %5039 = vmatprep.subr.bf16.mxu0 %v6243_v57 }
 0x4dc   :  { %5041 = vmatpush3.bf16.msra.mxu0 %v6250_v58 }
 0x4dd   :  { %5043 = vmatprep.subr.bf16.mxu0 %v6255_v62 }
 0x4e0   :  { %5045 = vmatpush3.bf16.msra.mxu0 %v6262_v8 }
 0x4e1   :  { %5047 = vmatprep.subr.bf16.mxu0 %v6267_v7 }
 0x4e4   :  { %5049 = vmatpush3.bf16.msra.mxu0 %v6274_v9 }
 0x4e5   :  { %5051 = vmatprep.subr.bf16.mxu0 %v6291_v40 }
 0x4e7   :  { %v4200_v19 = vpop.f32.mrb[10].mxu1 }
 0x4e8   :  { %5053 = vmatpush3.bf16.msra.mxu0 %v6298_v0  ;;  %v4201_v20 = vpop.f32.mrb[11].mxu1 }
 0x4e9   :  { %v4202_v21 = vadd.f32 %v4201_v20, %v4200_v19  ;;  %5055 = vmatprep.subr.bf16.mxu0 %v6315_v26 }
 0x4eb   :  { %v4235_v24 = vpop.f32.mrb[24].mxu0 }
 0x4ec   :  { %5057 = vmatpush3.bf16.msra.mxu0 %v6322_v29  ;;  %v4236_v3 = vpop.f32.mrb[25].mxu0 }
 0x4ed   :  { %v4237_v2 = vadd.f32 %v4236_v3, %v4235_v24  ;;  %5059 = vmatprep.subr.bf16.mxu0 %v6329_v63 }
 0x4ef   :  { %v2451_v25 = vadd.f32 %v4237_v2, %v4202_v21 }
 0x4f0   :  { %5061 = vmatpush3.bf16.msra.mxu0 %v6335_v28  ;;  %v3016_v28 = vand.u32 31, %v5732_v51 }
 0x4f2   :  { %vm3019_vm11 = vcmp.eq.s32.totalorder %v3016_v28, %v6965_v52  ;;  %vm3022_vm3 = vcmp.eq.s32.totalorder %v3016_v28, %v6966_v30  ;;  %vm3025_vm15 = vcmp.eq.s32.totalorder %v3016_v28, %v6639_v50  ;;  %vm3028_vm2 = vcmp.eq.s32.totalorder %v3016_v28, %v6642_v48 }
 0x4f3   :  { %2928 = vmatmul.mubr.f32.vlgmr.msra.gmra.mrb[32].mxu0 %v2782_v5  ;;  %vm5101_vm4 = vmpackc.low %vm3022_vm3, %vm3019_vm11  ;;  %vm6970_vm11 = vcmask 1041408  }
 0x4f4   :  { %5102 = vmatprep.subr.msk.bf16.mxu0 %vm5101_vm4, %v6967_v60  ;;  %5118 = vmatprep.subr.msk.bf16.mxu1 %vm5101_vm4, %v6967_v60  ;;  %vm5105_vm0 = vmpackc.low %vm3028_vm2, %vm3025_vm15  ;;  %vm6972_vm4 = vcmask 523264   ;;  %vm3020_vm15 = vcmp.eq.s32.totalorder %v6645_v44, %v6965_v52  ;;  %vm3023_vm2 = vcmp.eq.s32.totalorder %v6645_v44, %v6966_v30  ;;  %v4152_v30 = vld [vmem:[%s6833_s3 + $0x40] sm:$0xff]  }
 0x4f5   :  { %5120 = vmatpush1.bf16.msk.msra.mxu1 %vm5103_vm14, %v6967_v60  ;;  %vm6971_vm3 = vmmov %vm6970_vm11 }
 0x4f6   :  { %5122 = vmatprep.subr.msk.bf16.mxu1 %vm5105_vm0, %v6967_v60  ;;  %vm6973_vm7 = vmmov %vm6971_vm3 }
 0x4f7   :  { %vm6974_vm8 = vmmov %vm6971_vm3 }
 0x4f9   :  { %5104 = vmatpush1.bf16.xpose.msk.msra.mxu0 %vm5103_vm14, %v6967_v60  ;;  %5124 = vmatpush1.bf16.msk.msra.mxu1 %vm5107_vm12, %v6967_v60  ;;  %vm3068_vm14 = vcmask 254976  }
 0x4fa   :  { %5106 = vmatprep.subr.msk.bf16.mxu0 %vm5105_vm0, %v6967_v60  ;;  %vm6975_vm0 = vcmask 1040384   ;;  %5132 = vmatprep.subr.bf16.mxu1 %v4152_v30 }
 0x501   :  { %5108 = vmatpush1.bf16.xpose.msk.msra.mxu0 %vm5107_vm12, %v6967_v60  ;;  %vm6979_vm12 = vmmov %vm6975_vm0 }
 0x502   :  { %5109 = vmatprep.subr.bf16.mxu0 %v6950_v41 }
 0x51b   :  { %v2520_v6 = vpop.f32.mrb[12].mxu1 }
 0x51c   :  { %v2521_v14 = vadd.f32 %v2520_v6, %v2451_v25  ;;  %v2522_v15 = vpop.f32.mrb[13].mxu1 }
 0x566   :  { %v4270_v57 = vpop.f32.mrb[26].mxu0 }
 0x567   :  { %v4271_v58 = vpop.f32.mrb[27].mxu0 }
 0x568   :  { %v4272_v62 = vadd.f32 %v4271_v58, %v4270_v57 }
 0x569   :  { %v2759_v8 = vpop.f32.mrb[14].mxu1 }
 0x56a   :  { %v2761_v7 = vpop.f32.mrb[15].mxu1 }
 0x56b   :  { %v3811_v7 = vsel %vm3020_vm15, 1.0, %v6925_v33 }
 0x586   :  { %v4305_v9 = vpop.f32.mrb[28].mxu0 }
 0x587   :  { %v4306_v10 = vpop.f32.mrb[29].mxu0 }
 0x588   :  { %v4307_v17 = vadd.f32 %v4306_v10, %v4305_v9  ;;  %v3814_v9 = vsel %vm3023_vm2, 1.0, %v6925_v33 }
 0x58a   :  { %v2690_v40 = vadd.f32 %v4307_v17, %v4272_v62 }
 0x58c   :  { %v2760_v0 = vadd.f32 %v2759_v8, %v2690_v40 }
 0x58e   :  { %3004 = vrot.lane.b32.xlu1 %v2760_v0, %s5416_s6 }
 0x59d   :  { %v2999_v12 = vpop.f32.mrb[16].mxu1 }
 0x59e   :  { %v3001_v61 = vpop.f32.mrb[17].mxu1 }
 0x5a6   :  { %v4340_v26 = vpop.f32.mrb[30].mxu0 }
 0x5a7   :  { %v4341_v29 = vpop.f32.mrb[31].mxu0 }
 0x5a8   :  { %v4342_v63 = vadd.f32 %v4341_v29, %v4340_v26  ;;  %v5110_v26 = vpack.c.bf16 %v3814_v9, %v3811_v7  ;;  %v4161_v7 = vld [vmem:[%s6833_s3 + $0x88] sm:$0xff]   ;;  %v4159_v9 = vld [vmem:[%s6833_s3 + $0x78] sm:$0xff]  }
 0x5c6   :  { %v4375_v51 = vpop.f32.mrb[32].mxu0 }
 0x5c7   :  { %v4376_v27 = vpop.f32.mrb[33].mxu0 }
 0x5c8   :  { %v4377_v45 = vadd.f32 %v4376_v27, %v4375_v51  ;;  %v3817_v27 = vsel %vm3026_vm5, 1.0, %v6925_v33 }
 0x5ca   :  { %v2930_v1 = vadd.f32 %v4377_v45, %v4342_v63 }
 0x5cc   :  { %v3000_v53 = vadd.f32 %v2999_v12, %v2930_v1 }
 0x5ce   :  { %3008 = vrot.lane.b32.xlu0 %v3000_v53, %s5415_s30  ;;  %v5114_v53 = vpack.c.bf16 %v3820_v36, %v3817_v27 }
 0x600   :  { %v3005_v59 = vpop.permute.xlu1 %3004 }
 0x601   :  { %v6662_v31 = vsel %vm6969_vm13, %v2521_v14, %v3005_v59  ;;  %vm6980_vm13 = vmmov %vm6975_vm0 }
 0x602   :  { %v3076_v4 = vmul.f32 %v6662_v31, %v6662_v31  ;;  %v3054_v23 = vsel %vm6971_vm3, %v6662_v31, 0.0  ;;  %vm5126_vm3 = vmpackc.low %vm3023_vm2, %vm3020_vm15 }
 0x603   :  { %v3055_v34 = vrot.slane %v3054_v23, 4 }
 0x604   :  { %v3079_v39 = vsel %vm6970_vm11, %v3076_v4, 0.0  ;;  %vm6981_vm11 = vmmov %vm6976_vm1 }
 0x605   :  { %v3080_v42 = vrot.slane %v3079_v39, 4  ;;  %v3056_v35 = vadd.f32 %v3055_v34, %v3054_v23 }
 0x607   :  { %v3081_v47 = vadd.f32 %v3080_v42, %v3079_v39  ;;  %v3057_v11 = vrot.slane %v3056_v35, 2 }
 0x609   :  { %v3082_v49 = vrot.slane %v3081_v47, 2  ;;  %v3058_v3 = vadd.f32 %v3057_v11, %v3056_v35 }
 0x60b   :  { %v3083_v19 = vadd.f32 %v3082_v49, %v3081_v47  ;;  %v3059_v58 = vrot.slane %v3058_v3, 1 }
 0x60d   :  { %v3084_v14 = vrot.slane %v3083_v19, 1  ;;  %v3060_v61 = vadd.f32 %v3059_v58, %v3058_v3  ;;  %v4145_v3 = vld [vmem:[%s6833_s3 + $0x8] sm:$0xff]   ;;  %v4160_v58 = vld [vmem:[%s6833_s3 + $0x80] sm:$0xff]  }
 0x60f   :  { %v3085_v17 = vadd.f32 %v3084_v14, %v3083_v19  ;;  %v4148_v14 = vld [vmem:[%s6833_s3 + $0x20] sm:$0xff]  }
 0x611   :  { %v3100_v32 = vsel %vm6979_vm12, %v3060_v61, %v3085_v17 }
 0x640   :  { %v6669_v43 = vpop.permute.xlu0 %3008 }
 0x641   :  { %v6673_v22 = vsel %vm6972_vm4, %v3005_v59, %v6669_v43  ;;  %v3078_v54 = vmul.f32 %v6669_v43, %v6669_v43  ;;  %v3069_v2 = vsel %vm3068_vm14, %v6669_v43, 0.0  ;;  %vm5129_vm4 = vmpackc.low %vm3029_vm10, %vm3026_vm5 }
 0x642   :  { %v3061_v55 = vsel %vm6973_vm7, %v6673_v22, 0.0  ;;  %v3077_v46 = vmul.f32 %v6673_v22, %v6673_v22  ;;  %v3070_v62 = vrot.slane %v3069_v2, 4  ;;  %vm6983_vm5 = vmmov %vm6975_vm0 }
 0x643   :  { %v3062_v56 = vrot.slane %v3061_v55, 4  ;;  %v3093_v20 = vsel %vm3068_vm14, %v3078_v54, 0.0  ;;  %v6982_v54 = vld [vmem:[#allocation8_spill] sm:$0xff]  ;;  %vm6984_vm10 = vmmov %vm6976_vm1 }
 0x644   :  { %v3086_v13 = vsel %vm6974_vm8, %v3077_v46, 0.0  ;;  %v3094_v6 = vrot.slane %v3093_v20, 4  ;;  %v3071_v12 = vadd.f32 %v3070_v62, %v3069_v2  ;;  %vm6985_vm7 = vmmov %vm6976_vm1  ;;  %v4154_v2 = vld [vmem:[%s6833_s3 + $0x50] sm:$0xff]   ;;  %vm3679_vm8 = vcmask 50176  }
 0x645   :  { %v3063_v16 = vadd.f32 %v3062_v56, %v3061_v55  ;;  %v3087_v18 = vrot.slane %v3086_v13, 4  ;;  %v4158_v62 = vld [vmem:[%s6833_s3 + $0x70] sm:$0xff]  }
 0x646   :  { %v3095_v10 = vadd.f32 %v3094_v6, %v3093_v20  ;;  %v3072_v51 = vrot.slane %v3071_v12, 2  ;;  %v4030_v20 = vld [vmem:[%s6833_s3] sm:$0xff]  }
 0x647   :  { %v3064_v21 = vrot.slane %v3063_v16, 2  ;;  %v3088_v24 = vadd.f32 %v3087_v18, %v3086_v13  ;;  %v4156_v6 = vld [vmem:[%s6833_s3 + $0x60] sm:$0xff]  }
 0x648   :  { %v3096_v28 = vrot.slane %v3095_v10, 2  ;;  %v3073_v1 = vadd.f32 %v3072_v51, %v3071_v12 }
 0x649   :  { %v3065_v25 = vadd.f32 %v3064_v21, %v3063_v16  ;;  %v3089_v5 = vrot.slane %v3088_v24, 2 }
 0x64a   :  { %v3097_v45 = vadd.f32 %v3096_v28, %v3095_v10  ;;  %v3074_v4 = vrot.slane %v3073_v1, 1  ;;  %v4151_v10 = vld [vmem:[%s6833_s3 + $0x38] sm:$0xff]  }
 0x64b   :  { %v3066_v15 = vrot.slane %v3065_v25, 1  ;;  %v3090_v57 = vadd.f32 %v3089_v5, %v3088_v24  ;;  %v4153_v24 = vld [vmem:[%s6833_s3 + $0x48] sm:$0xff]   ;;  %v4155_v5 = vld [vmem:[%s6833_s3 + $0x58] sm:$0xff]  }
 0x64c   :  { %v3098_v59 = vrot.slane %v3097_v45, 1  ;;  %v3075_v23 = vadd.f32 %v3074_v4, %v3073_v1 }
 0x64d   :  { %v3091_v8 = vrot.slane %v3090_v57, 1  ;;  %v3067_v40 = vadd.f32 %v3066_v15, %v3065_v25  ;;  %v4146_v25 = vld [vmem:[%s6833_s3 + $0x10] sm:$0xff]   ;;  %v4157_v15 = vld [vmem:[%s6833_s3 + $0x68] sm:$0xff]  }
 0x64e   :  { %v3099_v39 = vadd.f32 %v3098_v59, %v3097_v45 }
 0x64f   :  { %v3092_v0 = vadd.f32 %v3091_v8, %v3090_v57  ;;  %v4149_v57 = vld [vmem:[%s6833_s3 + $0x28] sm:$0xff]   ;;  %v4150_v8 = vld [vmem:[%s6833_s3 + $0x30] sm:$0xff]  }
 0x650   :  { %v3102_v42 = vsel %vm6980_vm13, %v3075_v23, %v3099_v39 }
 0x651   :  { %v3101_v29 = vsel %vm6975_vm0, %v3067_v40, %v3092_v0 }
 0x652   :  { %3182 = vmatprep.mubr.f32.mxu0 %v3101_v29 }
 0x653   :  { %3183 = vmatmul.mubr.f32.vlgmr.msra.gmra.mrb[34].mxu0 %v3100_v32 }
 0x654   :  { %5112 = vmatpush3.bf16.xpose.msk.msra.mxu0 %vm6698_vm9, %v5110_v26  ;;  %4450 = vmatprep.mubr.msk.f32.mxu0 %vm5419_vm6, %v6925_v33 }
 0x655   :  { %5113 = vmatprep.subr.bf16.mxu0 %v6950_v41 }
 0x65c   :  { %5116 = vmatpush3.bf16.xpose.msk.msra.mxu0 %vm6698_vm9, %v5114_v53 }
 0x65d   :  { %5125 = vmatprep.subr.bf16.mxu0 %v6950_v41 }
 0x663   :  { %4451 = vmatmul.mubr.msk.f32.vlgmr.msra.gmra.mrb[34].mxu0 %vm6981_vm11, %v3102_v42 }
 0x664   :  { %4461 = vmatprep.mubr.msk.f32.mxu0 %vm5419_vm6, %v6925_v33  ;;  %5127 = vmatpush3.bf16.msk.msra.mxu0 %vm5126_vm3, %v6967_v60 }
 0x665   :  { %5128 = vmatprep.subr.bf16.mxu0 %v6950_v41 }
 0x668   :  { %5130 = vmatpush3.bf16.msk.msra.mxu0 %vm5129_vm4, %v6967_v60 }
 0x669   :  { %5163 = vmatprep.subr.bf16.mxu0 %v6950_v41 }
 0x736   :  { %v3254_v34 = vpop.f32.mrb[34].mxu0 }
 0x737   :  { %v3258_v47 = vmul.f32 0.055555556, %v3254_v34  ;;  %v4452_v35 = vpop.f32.mrb[35].mxu0 }
 0x739   :  { %v3259_v49 = vmul.f32 %v3258_v47, %v3258_v47 }
 0x73b   :  { %v3261_v55 = vrot.slane %v3259_v49, 7 }
 0x73d   :  { %v3263_v46 = vsub.f32 %v3258_v47, %v3261_v55 }
 0x73f   :  { %v3264_v50 = vmax.f32 %v3263_v46, 0.0 }
 0x741   :  { %v3265_v56 = vadd.f32 1e-05, %v3264_v50 }
 0x743   :  { %5370 = vrsqrt.f32 %v3265_v56 }
 0x74d   :  { %v5371_v48 = vpop.eup %5370 }
 0x74e   :  { %v3268_v44 = vrot.slane %v5371_v48, 7 }
 0x750   :  { %v3270_v60 = vmul.f32 %v3268_v44, %v6982_v54 }
 0x752   :  { %v3272_v11 = vrot.slane %v3270_v60, 2 }
 0x754   :  { %v3274_v13 = vmul.f32 %v3272_v11, %v3258_v47 }
 0x756   :  { %v3276_v16 = vrot.slane %v3274_v13, 5 }
 0x758   :  { %v3278_v18 = vsub.f32 %v6982_v54, %v3276_v16 }
 0x75a   :  { %v3280_v19 = vrot.slane %v3278_v18, 2 }
 0x75c   :  { %v3282_v21 = vsel %vm6983_vm5, %v3272_v11, %v3280_v19 }
 0x75d   :  { %3842 = vmatmul.mubr.msk.f32.vlgmr.msra.gmra.mrb[18].mxu1 %vm6984_vm10, %v3282_v21  ;;  %4462 = vmatmul.mubr.msk.f32.vlgmr.msra.gmra.mrb[36].mxu0 %vm6985_vm7, %v3282_v21 }
 0x75e   :  { %5134 = vmatpush3.bf16.msra.mxu1 %v4030_v20  ;;  %4472 = vmatprep.mubr.msk.f32.mxu0 %vm5419_vm6, %v6925_v33  ;;  %v4147_v33 = vld [vmem:[%s6833_s3 + $0x18] sm:$0xff]   ;;  %vm6986_vm6 = vmmov %vm6976_vm1 }
 0x75f   :  { %5136 = vmatprep.subr.bf16.mxu1 %v4153_v24  ;;  %5165 = vmatpush3.bf16.msra.mxu0 %v4160_v58 }
 0x760   :  { %5166 = vmatprep.subr.bf16.mxu0 %v6950_v41 }
 0x762   :  { %5138 = vmatpush3.bf16.msra.mxu1 %v4145_v3 }
 0x763   :  { %5140 = vmatprep.subr.bf16.mxu1 %v4154_v2  ;;  %5168 = vmatpush3.bf16.msra.mxu0 %v4161_v7 }
 0x766   :  { %5142 = vmatpush3.bf16.msra.mxu1 %v4146_v25 }
 0x767   :  { %5144 = vmatprep.subr.bf16.mxu1 %v4155_v5 }
 0x76a   :  { %5146 = vmatpush3.bf16.msra.mxu1 %v4147_v33 }
 0x76b   :  { %5148 = vmatprep.subr.bf16.mxu1 %v4156_v6 }
 0x76e   :  { %5150 = vmatpush3.bf16.msra.mxu1 %v4148_v14 }
 0x76f   :  { %5152 = vmatprep.subr.bf16.mxu1 %v4157_v15 }
 0x772   :  { %5154 = vmatpush3.bf16.msra.mxu1 %v4149_v57 }
 0x773   :  { %5156 = vmatprep.subr.bf16.mxu1 %v4158_v62 }
 0x776   :  { %5158 = vmatpush3.bf16.msra.mxu1 %v4150_v8 }
 0x777   :  { %5160 = vmatprep.subr.bf16.mxu1 %v4159_v9 }
 0x77a   :  { %5162 = vmatpush3.bf16.msra.mxu1 %v4151_v10 }
 0x830   :  { %v3352_v17 = vpop.f32.mrb[18].mxu1  ;;  %v3423_v40 = vpop.f32.mrb[36].mxu0 }
 0x831   :  { %v3430_v41 = vrot.slane %v3352_v17, %v6340_v37  ;;  %v3438_v0 = vrot.slane %v3423_v40, %v6340_v37  ;;  %v3354_v12 = vpop.f32.mrb[19].mxu1  ;;  %v4463_v61 = vpop.f32.mrb[37].mxu0  ;;  %v3445_v63 = vrot.slane %v3352_v17, %v6343_v38  ;;  %v3453_v32 = vrot.slane %v3423_v40, %v6343_v38 }
 0x832   :  { %v3434_v26 = vrot.slane %v3354_v12, %v6340_v37  ;;  %v3449_v27 = vrot.slane %v3354_v12, %v6343_v38  ;;  %v3534_v37 = vsub.s32 4, %v6965_v52 }
 0x833   :  { %v3439_v29 = vmul.f32 %v3430_v41, %v6662_v31  ;;  %v3441_v28 = vmul.f32 %v3438_v0, %v6669_v43 }
 0x834   :  { %v3440_v51 = vmul.f32 %v3434_v26, %v6673_v22  ;;  %v5376_v22 = vld [vmem:[%s6834_s4] sm:$0xff]  ;;  %s5420_s4 = smov [#allocation2]  }
 0x835   :  { %v3454_v36 = vadd.f32 %v3445_v63, %v3439_v29  ;;  %v3456_v45 = vadd.f32 %v3453_v32, %v3441_v28  ;;  %v3535_v38 = vrot.slane %v5376_v22, %v3534_v37  ;;  %s3698_s0 = sshll.u32 %s5420_s4, 4  ;;  %s3699_s0 = int_to_ptr.vmem [resolvable:$true] %s3698_s0 }
 0x836   :  { %v3455_v1 = vadd.f32 %v3449_v27, %v3440_v51  ;;  %s5377_s7 = scalar_lea.vmem %s3699_s0, 32  ;;  %p5382_p1 = scmp.lt.s32.totalorder %s3699_s0, %s3699_s0 }
 0x837   :  { %v3459_v53 = vmax.f32 %v3456_v45, 0.0  ;;  %v3457_v4 = vmax.f32 %v3454_v36, 0.0  ;;  %p5378_p0 = scmp.ne.s32.totalorder %s3699_s0, %s5377_s7  ;;  %p5383_p2 = scmp.lt.s32.totalorder %s5377_s7, %s5377_s7 }
 0x838   :  { %v3458_v59 = vmax.f32 %v3455_v1, 0.0 }
 0x839   :  { %4473 = vmatmul.mubr.msk.f32.vlgmr.msra.gmra.mrb[38].mxu0 %vm6986_vm6, %v3459_v53  ;;  %p5384_p3 = por %p5383_p2, %p5382_p1 }
 0x83a   :  { %3603 = vmatprep.mubr.f32.mxu1 %v3458_v59 }
 0x83b   :  { %3604 = vmatmul.mubr.f32.vlgmr.msra.gmra.mrb[20].mxu1 %v3457_v4  ;;  %p5385_p4 = pnand %p5384_p3, %p5378_p0 }
 0x90c   :  { %v3675_v31 = vpop.f32.mrb[38].mxu0 }
 0x90d   :  { %v4474_v43 = vpop.f32.mrb[39].mxu0 }
 0x90e   :  { %v4420_v39 = vpop.f32.mrb[20].mxu1 }
 0x90f   :  { %v4421_v23 = vpop.f32.mrb[21].mxu1 }
 0x910   :  { %v4422_v42 = vadd.f32 %v4421_v23, %v4420_v39 }
 0x912   :  { %v3606_v30 = vadd.f32 %v4422_v42, %v3535_v38 }
 0x914   :  { %v3676_v34 = vadd.f32 %v3675_v31, %v3606_v30 }
 0x916   :  { %v3680_v47 = vsel %vm3679_vm8, %v3676_v34, -inf }
 0x917   :  { %3681 = vmax.xlane.f32.xlu1 %v3680_v47 }
 0x9a4   :  { %v3682_v35 = vpop.xlane.xlu1 %3681 }
 0x9a5   :  { %v3683_v49 = vsub.f32 %v3676_v34, %v3682_v35 }
 0x9a7   :  { %v3684_v55 = vmul.f32 1.442695, %v3683_v49 }
 0x9a9   :  { %5372 = vpow2.f32 %v3684_v55 }
 0x9b3   :  { %v5373_v52 = vpop.eup %5372 }
 0x9b4   :  { %v3686_v46 = vsel %vm3679_vm8, %v5373_v52, 0.0 }
 0x9b5   :  { %3687 = vadd.xlane.f32.xlu0 %v3686_v46 }
 0xa42   :  { %v3688_v50 = vpop.xlane.xlu0 %3687 }
 0xa43   :  { %5374 = vrcp.f32 %v3688_v50 }
 0xa4d   :  { %v5375_v56 = vpop.eup %5374 }
 0xa4e   :  { %v3690_v48 = vmul.f32 %v5375_v56, %v5373_v52 }
 0xa50   :  { %3691 = vst.msk [vmem:[#allocation2] sm:$0x3] %vm3679_vm8, %v3690_v48 }
 0xa51   :  { %5388 = shalt.err (!%p5385_p4)
}
 0xa52   :  { %s5389_s10 = scalar_lea.hbm %s6835_s5, 32 }
 0xa53   :  { %p5390_p5 = scmp.ne.s32.totalorder %s6835_s5, %s5389_s10  ;;  %p5393_p6 = scmp.lt.u32.totalorder %s5389_s10, %s6835_s5 }
 0xa55   :  { %p5395_p7 = pnand %p5393_p6, %p5390_p5 }
 0xa57   :  { %5398 = shalt.err (!%p5395_p7)
}
 0xa58   :  { %3701 = dma.vmem_to_hbm [thread:$0]  %s3699_s0, 32, %s6835_s5, [#allocation3]  }
 0xa59   :  { %5399 = dma.done.wait [#allocation3], 32  }
 0xa5a   :  { %5400 = vsyncadd [#allocation3], 4294967264 }
 0xa5b   :  { %3705 = vsyncpa [#allocation3], 1 }

</bundles_post_ra>
